<compile_context>
chip_gen: v7x
topology: tpu7x:2x2x1
jax: 0.10.0
libtpu: 0.0.40
codegen_flags: <defaults>
</compile_context>

<pallas_src>
import jax
import jax.numpy as jnp
from jax.experimental import pallas as pl
from jax.experimental.pallas import tpu as pltpu

EPS = 1e-3


def _build_kernel(cout):
    """Kernel closed over the static output-channel count (for param slicing)."""

    def kernel(x_ref, w1_ref, g1_ref, w2_ref, g2b2_ref, o_ref):
        # x_ref   : (Cin, P)    channel-major input (free reshape of NCHW, N=1)
        # w1_ref  : (Chid, Cin) conv2d13 weight (1x1 kernel squeezed)
        # g1_ref  : (1, Chid)   bn1 gamma as a lane-oriented row
        # w2_ref  : (Cout, Chid) conv2d14 weight
        # g2b2_ref: (2*Cout, 1) rows [0:Cout]=bn2 gamma, [Cout:2*Cout]=bn2 beta
        # o_ref   : (Cout, P)
        x = x_ref[...]
        p = x.shape[-1]
        inv_p = jnp.float32(1.0 / p)

        # conv2d13 (1x1, no bias): (Chid,Cin) @ (Cin,P) -> (Chid,P)
        y1 = jnp.dot(w1_ref[...], x, preferred_element_type=jnp.float32)

        # batchnorm2d11 statistics, single pass, computed as ROWS via tiny MXU
        # matvecs (contract the P axis of both operands) -> no transposes.
        ones_rows = jnp.ones((8, p), dtype=jnp.float32)
        dn = (((1,), (1,)), ((), ()))
        s1 = jax.lax.dot_general(ones_rows, y1, dimension_numbers=dn,
                                 preferred_element_type=jnp.float32)[0:1, :]
        q1 = jax.lax.dot_general(ones_rows, y1 * y1, dimension_numbers=dn,
                                 preferred_element_type=jnp.float32)[0:1, :]
        mean1 = s1 * inv_p                                   # (1, Chid)
        var1 = q1 * inv_p - mean1 * mean1                    # biased variance
        scale1 = g1_ref[...] * jax.lax.rsqrt(var1 + EPS)     # (1, Chid)

        # Fold BN1's scale into conv2d14's weights. The omitted per-channel
        # constants (beta1 and -mean1*scale1) become per-output-channel
        # constants after the 1x1 conv and are cancelled exactly by BN2's mean
        # subtraction below, so they never need to be materialized.
        w2s = w2_ref[...] * scale1                           # (Cout, Chid)

        # conv2d14 (1x1, no bias) with BN1 folded: (Cout,Chid)@(Chid,P)
        y2 = jnp.dot(w2s, y1, preferred_element_type=jnp.float32)

        # batchnorm2d12: single-pass stats + fused affine.
        mean2 = jnp.sum(y2, axis=-1, keepdims=True) * inv_p  # (Cout, 1)
        ex2 = jnp.sum(y2 * y2, axis=-1, keepdims=True) * inv_p
        var2 = ex2 - mean2 * mean2
        g2 = g2b2_ref[0:cout, :]                             # (Cout, 1)
        b2 = g2b2_ref[cout:2 * cout, :]                      # (Cout, 1)
        scale2 = g2 * jax.lax.rsqrt(var2 + EPS)              # (Cout, 1)
        o_ref[...] = y2 * scale2 + (b2 - mean2 * scale2)

    return kernel


@jax.jit
def model_forward(x_nchw, w1, g1, b1, w2, g2, b2):
    """x_nchw: (1, Cin, H, W) f32 -> (1, Cout, H, W) f32.

    w1: (Chid, Cin), w2: (Cout, Chid) (PyTorch 1x1 conv weights, squeezed);
    g*/b*: 1-D per-channel BN affine parameters. b1 is accepted for API
    compatibility but has provably no effect on the output (see kernel).
    """
    del b1  # cancels exactly under batchnorm2d12's mean subtraction
    N, C, H, W = x_nchw.shape
    if N != 1:
        # TODO(synk): for N > 1, fold the batch into the P axis (training-mode
        # BN reduces over N*H*W); a naive per-image grid would compute wrong
        # per-image statistics. On v7x a batch-parallel grid would also need a
        # cross-step stats accumulation to stay correct.
        raise NotImplementedError("kernel assumes batch size 1")
    P = H * W
    chid = w1.shape[0]
    cout = w2.shape[0]

    x2d = x_nchw.reshape(C, P)                       # free reshape (channel-major)
    g1_row = g1.reshape(1, chid)
    g2b2 = jnp.concatenate([g2.reshape(cout, 1), b2.reshape(cout, 1)], axis=0)

    flops = 2 * P * (chid * C + cout * chid + 2 * chid)   # convs + stat matvecs
    bytes_accessed = 4 * (C * P + cout * P + chid * C + cout * chid + chid + 2 * cout)

    vmem = pl.BlockSpec(memory_space=pltpu.MemorySpace.VMEM)
    out2d = pl.pallas_call(
        _build_kernel(cout),
        out_shape=jax.ShapeDtypeStruct((cout, P), jnp.float32),
        in_specs=[vmem] * 5,
        out_specs=vmem,
        cost_estimate=pl.CostEstimate(
            flops=flops,
            transcendentals=chid + cout,
            bytes_accessed=bytes_accessed,
        ),
    )(x2d, w1, g1_row, w2, g2b2)

    return out2d.reshape(1, cout, H, W)              # free reshape back to NCHW


def reference_forward(x_nchw, w1, g1, b1, w2, g2, b2):
    """Pure-JAX reference matching the PyTorch module (training-mode BN)."""
    N, C, H, W = x_nchw.shape
    x2d = jnp.transpose(x_nchw, (0, 2, 3, 1)).reshape(N * H * W, C)
    y1 = x2d @ w1.T
    m1 = jnp.mean(y1, axis=0)
    v1 = jnp.mean((y1 - m1) ** 2, axis=0)
    y1n = (y1 - m1) / jnp.sqrt(v1 + EPS) * g1 + b1
    y2 = y1n @ w2.T
    m2 = jnp.mean(y2, axis=0)
    v2 = jnp.mean((y2 - m2) ** 2, axis=0)
    y2n = (y2 - m2) / jnp.sqrt(v2 + EPS) * g2 + b2
    return jnp.transpose(y2n.reshape(N, H, W, -1), (0, 3, 1, 2))


if __name__ == "__main__":
    key = jax.random.PRNGKey(0)
    k_x, k_w1, k_w2, k_g1, k_b1, k_g2, k_b2 = jax.random.split(key, 7)

    # Input consistent with the module: NCHW (1, 72, 28, 28)
    x = jax.random.normal(k_x, (1, 72, 28, 28), dtype=jnp.float32)

    # Conv2d(72, 40, 1x1, bias=False): weight (40, 72, 1, 1) -> (40, 72)
    w1 = jax.random.normal(k_w1, (40, 72), dtype=jnp.float32) * (1.0 / jnp.sqrt(72.0))
    # Conv2d(40, 120, 1x1, bias=False): weight (120, 40, 1, 1) -> (120, 40)
    w2 = jax.random.normal(k_w2, (120, 40), dtype=jnp.float32) * (1.0 / jnp.sqrt(40.0))

    # Non-trivial BN affine params (exercises full BN semantics, including the
    # exact cancellation of beta1 under the downstream batch norm).
    g1 = 1.0 + 0.1 * jax.random.normal(k_g1, (40,), dtype=jnp.float32)
    b1 = 0.1 * jax.random.normal(k_b1, (40,), dtype=jnp.float32)
    g2 = 1.0 + 0.1 * jax.random.normal(k_g2, (120,), dtype=jnp.float32)
    b2 = 0.1 * jax.random.normal(k_b2, (120,), dtype=jnp.float32)

    out = model_forward(x, w1, g1, b1, w2, g2, b2)
    jax.block_until_ready(out)

    ref = reference_forward(x, w1, g1, b1, w2, g2, b2)
    assert out.shape == (1, 120, 28, 28), out.shape
    err = float(jnp.max(jnp.abs(out - ref)))
    assert jnp.allclose(out, ref, atol=1e-4, rtol=1e-4), (
        f"mismatch vs reference, max |err|={err}")

    print("KERNEL_OK")
</pallas_src>

<mosaic_0001>
module attributes {stable_mosaic.version = 11 : i64} {
  func.func @kernel(%arg0: memref<72x784xf32, #tpu.memory_space<vmem>>, %arg1: memref<40x72xf32, #tpu.memory_space<vmem>>, %arg2: memref<1x40xf32, #tpu.memory_space<vmem>>, %arg3: memref<120x40xf32, #tpu.memory_space<vmem>>, %arg4: memref<240x1xf32, #tpu.memory_space<vmem>>, %arg5: memref<120x784xf32, #tpu.memory_space<vmem>>) attributes {dimension_semantics = [], scalar_prefetch = 0 : i64, scratch_operands = 0 : i64, tpu.core_type = #tpu.core_type<tc>} {
    %c0 = arith.constant 0 : index
    %c0_0 = arith.constant 0 : index
    %0 = vector.load %arg0[%c0, %c0_0] : memref<72x784xf32, #tpu.memory_space<vmem>>, vector<72x784xf32>
    %c0_1 = arith.constant 0 : index
    %c0_2 = arith.constant 0 : index
    %1 = vector.load %arg1[%c0_1, %c0_2] : memref<40x72xf32, #tpu.memory_space<vmem>>, vector<40x72xf32>
    %cst = arith.constant dense<0.000000e+00> : vector<40x784xf32>
    %2 = tpu.matmul %1, %0, %cst {dimension_numbers = #tpu.dot_dimension_numbers<[1], [0], [0], [1], [0, 0, 1, 1], [], []>} : vector<40x72xf32>, vector<72x784xf32>, vector<40x784xf32> -> vector<40x784xf32>
    %cst_3 = arith.constant 1.000000e+00 : f32
    %3 = vector.broadcast %cst_3 : f32 to vector<8x784xf32>
    %cst_4 = arith.constant dense<0.000000e+00> : vector<8x40xf32>
    %4 = tpu.matmul %3, %2, %cst_4 {dimension_numbers = #tpu.dot_dimension_numbers<[1], [1], [0], [0], [0, 0, 1, 0], [], []>} : vector<8x784xf32>, vector<40x784xf32>, vector<8x40xf32> -> vector<8x40xf32>
    %5 = vector.extract_strided_slice %4 {offsets = [0, 0], sizes = [1, 40], strides = [1, 1]} : vector<8x40xf32> to vector<1x40xf32>
    %6 = arith.mulf %2, %2 : vector<40x784xf32>
    %cst_5 = arith.constant dense<0.000000e+00> : vector<8x40xf32>
    %7 = tpu.matmul %3, %6, %cst_5 {dimension_numbers = #tpu.dot_dimension_numbers<[1], [1], [0], [0], [0, 0, 1, 0], [], []>} : vector<8x784xf32>, vector<40x784xf32>, vector<8x40xf32> -> vector<8x40xf32>
    %8 = vector.extract_strided_slice %7 {offsets = [0, 0], sizes = [1, 40], strides = [1, 1]} : vector<8x40xf32> to vector<1x40xf32>
    %cst_6 = arith.constant 0.00127551018 : f32
    %9 = vector.broadcast %cst_6 : f32 to vector<1x40xf32>
    %10 = arith.mulf %5, %9 : vector<1x40xf32>
    %cst_7 = arith.constant 0.00127551018 : f32
    %11 = vector.broadcast %cst_7 : f32 to vector<1x40xf32>
    %12 = arith.mulf %8, %11 : vector<1x40xf32>
    %13 = arith.mulf %10, %10 : vector<1x40xf32>
    %14 = arith.subf %12, %13 : vector<1x40xf32>
    %c0_8 = arith.constant 0 : index
    %c0_9 = arith.constant 0 : index
    %15 = vector.load %arg2[%c0_8, %c0_9] : memref<1x40xf32, #tpu.memory_space<vmem>>, vector<1x40xf32>
    %cst_10 = arith.constant 1.000000e-03 : f32
    %16 = vector.broadcast %cst_10 : f32 to vector<1x40xf32>
    %17 = arith.addf %14, %16 : vector<1x40xf32>
    %18 = math.rsqrt %17 : vector<1x40xf32>
    %19 = arith.mulf %15, %18 : vector<1x40xf32>
    %c0_11 = arith.constant 0 : index
    %c0_12 = arith.constant 0 : index
    %20 = vector.load %arg3[%c0_11, %c0_12] : memref<120x40xf32, #tpu.memory_space<vmem>>, vector<120x40xf32>
    %21 = vector.broadcast %19 : vector<1x40xf32> to vector<120x40xf32>
    %22 = arith.mulf %20, %21 : vector<120x40xf32>
    %cst_13 = arith.constant dense<0.000000e+00> : vector<120x784xf32>
    %23 = tpu.matmul %22, %2, %cst_13 {dimension_numbers = #tpu.dot_dimension_numbers<[1], [0], [0], [1], [0, 0, 1, 1], [], []>} : vector<120x40xf32>, vector<40x784xf32>, vector<120x784xf32> -> vector<120x784xf32>
    %cst_14 = arith.constant dense<0.000000e+00> : vector<120xf32>
    %24 = vector.multi_reduction <add>, %23, %cst_14 [1] : vector<120x784xf32> to vector<120xf32>
    %25 = vector.shape_cast %24 : vector<120xf32> to vector<120x1xf32>
    %cst_15 = arith.constant 0.00127551018 : f32
    %26 = vector.broadcast %cst_15 : f32 to vector<120x1xf32>
    %27 = arith.mulf %25, %26 : vector<120x1xf32>
    %28 = arith.mulf %23, %23 : vector<120x784xf32>
    %cst_16 = arith.constant dense<0.000000e+00> : vector<120xf32>
    %29 = vector.multi_reduction <add>, %28, %cst_16 [1] : vector<120x784xf32> to vector<120xf32>
    %30 = vector.shape_cast %29 : vector<120xf32> to vector<120x1xf32>
    %cst_17 = arith.constant 0.00127551018 : f32
    %31 = vector.broadcast %cst_17 : f32 to vector<120x1xf32>
    %32 = arith.mulf %30, %31 : vector<120x1xf32>
    %33 = arith.mulf %27, %27 : vector<120x1xf32>
    %34 = arith.subf %32, %33 : vector<120x1xf32>
    %c0_18 = arith.constant 0 : index
    %c0_19 = arith.constant 0 : index
    %35 = vector.load %arg4[%c0_18, %c0_19] : memref<240x1xf32, #tpu.memory_space<vmem>>, vector<120x1xf32>
    %c120 = arith.constant 120 : index
    %c0_20 = arith.constant 0 : index
    %36 = vector.load %arg4[%c120, %c0_20] : memref<240x1xf32, #tpu.memory_space<vmem>>, vector<120x1xf32>
    %cst_21 = arith.constant 1.000000e-03 : f32
    %37 = vector.broadcast %cst_21 : f32 to vector<120x1xf32>
    %38 = arith.addf %34, %37 : vector<120x1xf32>
    %39 = math.rsqrt %38 : vector<120x1xf32>
    %40 = arith.mulf %35, %39 : vector<120x1xf32>
    %41 = vector.broadcast %40 : vector<120x1xf32> to vector<120x784xf32>
    %42 = arith.mulf %23, %41 : vector<120x784xf32>
    %43 = arith.mulf %27, %40 : vector<120x1xf32>
    %44 = arith.subf %36, %43 : vector<120x1xf32>
    %45 = vector.broadcast %44 : vector<120x1xf32> to vector<120x784xf32>
    %46 = arith.addf %42, %45 : vector<120x784xf32>
    %c0_22 = arith.constant 0 : index
    %c0_23 = arith.constant 0 : index
    %47 = vector.load %arg5[%c0_22, %c0_23] : memref<120x784xf32, #tpu.memory_space<vmem>>, vector<120x784xf32>
    tpu.vector_store %arg5[%c0_22, %c0_23], %46 {strides = array<i32>} : memref<120x784xf32, #tpu.memory_space<vmem>>, vector<120x784xf32>,
    return
  }
}

</mosaic_0001>

<bundles_post_ra>
// kernel: model_forward.1
= control target key start
LH: loop header
LB: loop body
LE: loop exit
PB: predicated region body
PF: predicated region fallthrough
CT: control target
= control target key end

     0   :  { %v3269_v3 = vmov 0.0   ;;  %vm88_vm0 = vcmask 588800   ;;  %vm3271_vm1 = vmmov 0   ;;  %vm479_vm2 = vcmask 130048   ;;  %s5275_s0 = inlined_call_operand.vmem [shape: f32[72,784], index: 0, kind: input, shape index: {}]   ;;  %s5276_s1 = inlined_call_operand.vmem [shape: f32[40,72], index: 1, kind: input, shape index: {}]   ;;  %s5277_s2 = inlined_call_operand.vmem [shape: f32[1,40], index: 2, kind: input, shape index: {}]   ;;  %s5278_s3 = inlined_call_operand.vmem [shape: f32[120,40], index: 3, kind: input, shape index: {}]   ;;  %s5279_s4 = inlined_call_operand.vmem [shape: f32[240,1], index: 4, kind: input, shape index: {}]   ;;  %s5280_s5 = inlined_call_operand.vmem [shape: f32[120,784], index: 5, kind: output, shape index: {}]  }
   0x1   :  { %v21_v0 = vld [vmem:[%s5275_s0 + $0x8] sm:$0xff]  ;;  %v28_v1 = vld [vmem:[%s5275_s0 + $0x40] sm:$0xff]  ;;  %168 = vmatprep.mubr.f32.mxu0 %v3269_v3  ;;  %263 = vmatprep.mubr.f32.mxu1 %v3269_v3  ;;  %v27_v5 = vld [vmem:[%s5275_s0 + $0x38] sm:$0xff]  ;;  %vm1152_vm4 = vcmask 326656  }
   0x2   :  { %v20_v2 = vld [vmem:[%s5275_s0] sm:$0xff]  ;;  %v3064_v4 = vpack.c.bf16 %v28_v1, %v21_v0  ;;  %v35_v6 = vld [vmem:[%s5275_s0 + $0x78] sm:$0xff]  ;;  %v42_v7 = vld [vmem:[%s5275_s0 + $0xb0] sm:$0xff] }
   0x3   :  { %v3066_v8 = vpack.c.bf16 %v27_v5, %v20_v2  ;;  %v3068_v9 = vpack.c.bf16 %v42_v7, %v35_v6  ;;  %v34_v10 = vld [vmem:[%s5275_s0 + $0x70] sm:$0xff]  ;;  %v41_v11 = vld [vmem:[%s5275_s0 + $0xa8] sm:$0xff]  ;;  %v56_v13 = vld [vmem:[%s5275_s0 + $0x120] sm:$0xff] }
   0x4   :  { %v49_v12 = vld [vmem:[%s5275_s0 + $0xe8] sm:$0xff]  ;;  %3065 = vmatprep.subr.bf16.mxu0 %v3064_v4  ;;  %v3070_v14 = vpack.c.bf16 %v41_v11, %v34_v10  ;;  %v48_v16 = vld [vmem:[%s5275_s0 + $0xe0] sm:$0xff]  ;;  %v55_v17 = vld [vmem:[%s5275_s0 + $0x118] sm:$0xff] }
   0x5   :  { %3067 = vmatpush1.bf16.msra.mxu0 %v3066_v8  ;;  %v3072_v15 = vpack.c.bf16 %v56_v13, %v49_v12  ;;  %v63_v18 = vld [vmem:[%s5275_s0 + $0x158] sm:$0xff]  ;;  %v70_v19 = vld [vmem:[%s5275_s0 + $0x190] sm:$0xff]  ;;  %v29_v25 = vld [vmem:[%s5275_s0 + $0x48] sm:$0xff]  ;;  %v3074_v27 = vpack.c.bf16 %v55_v17, %v48_v16 }
   0x6   :  { %3069 = vmatprep.subr.bf16.mxu0 %v3068_v9  ;;  %v23_v20 = vld [vmem:[%s5275_s0 + $0x18] sm:$0xff]  ;;  %v30_v21 = vld [vmem:[%s5275_s0 + $0x50] sm:$0xff]  ;;  %v37_v26 = vld [vmem:[%s5275_s0 + $0x88] sm:$0xff]  ;;  %v3076_v32 = vpack.c.bf16 %v70_v19, %v63_v18 }
   0x7   :  { %v62_v22 = vld [vmem:[%s5275_s0 + $0x150] sm:$0xff]  ;;  %v3080_v23 = vpack.c.bf16 %v30_v21, %v23_v20  ;;  %v69_v28 = vld [vmem:[%s5275_s0 + $0x188] sm:$0xff]  ;;  %v44_v30 = vld [vmem:[%s5275_s0 + $0xc0] sm:$0xff]  ;;  %v3270_v21 = vmov 0.0|0.0  }
   0x8   :  { %v22_v24 = vld [vmem:[%s5275_s0 + $0x10] sm:$0xff]  ;;  %v36_v31 = vld [vmem:[%s5275_s0 + $0x80] sm:$0xff]  ;;  %v3084_v33 = vpack.c.bf16 %v44_v30, %v37_v26  ;;  %v43_v34 = vld [vmem:[%s5275_s0 + $0xb8] sm:$0xff]  ;;  %v3078_v41 = vpack.c.bf16 %v69_v28, %v62_v22 }
   0x9   :  { %3071 = vmatpush1.bf16.msra.mxu0 %v3070_v14  ;;  %v3082_v29 = vpack.c.bf16 %v29_v25, %v22_v24  ;;  %3081 = vmatprep.subr.bf16.mxu1 %v3080_v23  ;;  %v51_v35 = vld [vmem:[%s5275_s0 + $0xf8] sm:$0xff]  ;;  %v58_v36 = vld [vmem:[%s5275_s0 + $0x130] sm:$0xff]  ;;  %v3086_v37 = vpack.c.bf16 %v43_v34, %v36_v31  ;;  %v57_v40 = vld [vmem:[%s5275_s0 + $0x128] sm:$0xff] }
   0xa   :  { %3073 = vmatprep.subr.bf16.mxu0 %v3072_v15  ;;  %v3088_v38 = vpack.c.bf16 %v58_v36, %v51_v35  ;;  %v50_v39 = vld [vmem:[%s5275_s0 + $0xf0] sm:$0xff]  ;;  %v65_v42 = vld [vmem:[%s5275_s0 + $0x168] sm:$0xff]  ;;  %v72_v43 = vld [vmem:[%s5275_s0 + $0x1a0] sm:$0xff]  ;;  %v3272_v35 = vmov 1.0  }
   0xb   :  { %3083 = vmatpush1.bf16.msra.mxu1 %v3082_v29  ;;  %v77_v44 = vld [vmem:[%s5275_s0 + $0x1c8] sm:$0xff]  ;;  %v3090_v45 = vpack.c.bf16 %v57_v40, %v50_v39  ;;  %v32_v47 = vld [vmem:[%s5275_s0 + $0x60] sm:$0xff]  ;;  %v3092_v48 = vpack.c.bf16 %v72_v43, %v65_v42  ;;  %v71_v50 = vld [vmem:[%s5275_s0 + $0x198] sm:$0xff] }
   0xc   :  { %3085 = vmatprep.subr.bf16.mxu1 %v3084_v33  ;;  %v25_v46 = vld [vmem:[%s5275_s0 + $0x28] sm:$0xff]  ;;  %v64_v49 = vld [vmem:[%s5275_s0 + $0x160] sm:$0xff]  ;;  %v31_v52 = vld [vmem:[%s5275_s0 + $0x58] sm:$0xff] }
   0xd   :  { %3075 = vmatpush1.bf16.msra.mxu0 %v3074_v27  ;;  %v24_v51 = vld [vmem:[%s5275_s0 + $0x20] sm:$0xff]  ;;  %v3096_v54 = vpack.c.bf16 %v32_v47, %v25_v46  ;;  %v39_v55 = vld [vmem:[%s5275_s0 + $0x98] sm:$0xff]  ;;  %v46_v56 = vld [vmem:[%s5275_s0 + $0xd0] sm:$0xff]  ;;  %v3094_v58 = vpack.c.bf16 %v71_v50, %v64_v49 }
   0xe   :  { %3077 = vmatprep.subr.bf16.mxu0 %v3076_v32  ;;  %v76_v53 = vld [vmem:[%s5275_s0 + $0x1c0] sm:$0xff]  ;;  %v3098_v59 = vpack.c.bf16 %v31_v52, %v24_v51  ;;  %v79_v60 = vld [vmem:[%s5275_s0 + $0x1d8] sm:$0xff]  ;;  %v3100_v61 = vpack.c.bf16 %v46_v56, %v39_v55  ;;  %v38_v62 = vld [vmem:[%s5275_s0 + $0x90] sm:$0xff] }
   0xf   :  { %3087 = vmatpush1.bf16.msra.mxu1 %v3086_v37  ;;  %v3429_v57 = vld [vmem:[%s5276_s1] sm:$0xff]  ;;  %v45_v63 = vld [vmem:[%s5275_s0 + $0xc8] sm:$0xff]  ;;  %v78_v4 = vld [vmem:[%s5275_s0 + $0x1d0] sm:$0xff] }
  0x10   :  { %3089 = vmatprep.subr.bf16.mxu1 %v3088_v38  ;;  %v53_v0 = vld [vmem:[%s5275_s0 + $0x108] sm:$0xff]  ;;  %v60_v1 = vld [vmem:[%s5275_s0 + $0x140] sm:$0xff]  ;;  %v3102_v5 = vpack.c.bf16 %v45_v63, %v38_v62  ;;  %v26_v6 = vld [vmem:[%s5275_s0 + $0x30] sm:$0xff] }
  0x11   :  { %3079 = vmatpush1.bf16.msra.mxu0 %v3078_v41  ;;  %v3452_v2 = vld [vmem:[%s5276_s1 + $0x8] sm:$0xff]  ;;  %v3104_v8 = vpack.c.bf16 %v60_v1, %v53_v0  ;;  %v52_v9 = vld [vmem:[%s5275_s0 + $0x100] sm:$0xff]  ;;  %v59_v10 = vld [vmem:[%s5275_s0 + $0x138] sm:$0xff] }
  0x12   :  { %120 = vmatprep.subr.mxu0 %v77_v44  ;;  %v33_v7 = vld [vmem:[%s5275_s0 + $0x68] sm:$0xff]  ;;  %v67_v11 = vld [vmem:[%s5275_s0 + $0x178] sm:$0xff]  ;;  %v74_v12 = vld [vmem:[%s5275_s0 + $0x1b0] sm:$0xff]  ;;  %v3106_v15 = vpack.c.bf16 %v59_v10, %v52_v9 }
  0x13   :  { %3091 = vmatpush1.bf16.msra.mxu1 %v3090_v45  ;;  %v3481_v13 = vld [vmem:[%s5276_s1 + $0x10] sm:$0xff]  ;;  %v3113_v14 = vpack.c.bf16 %v33_v7, %v26_v6  ;;  %v40_v16 = vld [vmem:[%s5275_s0 + $0xa0] sm:$0xff]  ;;  %v47_v17 = vld [vmem:[%s5275_s0 + $0xd8] sm:$0xff]  ;;  %v3108_v18 = vpack.c.bf16 %v74_v12, %v67_v11 }
  0x14   :  { %3093 = vmatprep.subr.bf16.mxu1 %v3092_v48  ;;  %v66_v19 = vld [vmem:[%s5275_s0 + $0x170] sm:$0xff]  ;;  %v73_v20 = vld [vmem:[%s5275_s0 + $0x1a8] sm:$0xff]  ;;  %v86_v22 = vld [vmem:[%s5276_s1 + $0x18] sm:$0xff]  ;;  %v3116_v23 = vpack.c.bf16 %v47_v17, %v40_v16 }
  0x15   :  { %121 = vmatpush1.msra.mxu0 %v76_v53  ;;  %v3110_v24 = vpack.c.bf16 %v73_v20, %v66_v19  ;;  %v54_v25 = vld [vmem:[%s5275_s0 + $0x110] sm:$0xff]  ;;  %v61_v26 = vld [vmem:[%s5275_s0 + $0x148] sm:$0xff]  ;;  %v87_v28 = vld [vmem:[%s5276_s1 + $0x20] sm:$0xff] }
  0x16   :  { %2812 = vmatmul.mubr.msk.f32.vlgmr.msra.gmra.mrb[0].mxu0 %vm88_vm0, %v3429_v57  ;;  %3097 = vmatprep.subr.bf16.mxu0 %v3096_v54  ;;  %v81_v27 = vld [vmem:[%s5275_s0 + $0x1e8] sm:$0xff]  ;;  %v3119_v29 = vpack.c.bf16 %v61_v26, %v54_v25  ;;  %v68_v30 = vld [vmem:[%s5275_s0 + $0x180] sm:$0xff]  ;;  %v75_v31 = vld [vmem:[%s5275_s0 + $0x1b8] sm:$0xff] }
  0x17   :  { %174 = vmatprep.mubr.f32.mxu0 %v3269_v3  ;;  %3095 = vmatpush1.bf16.msra.mxu1 %v3094_v58  ;;  %v80_v32 = vld [vmem:[%s5275_s0 + $0x1e0] sm:$0xff]  ;;  %v3122_v33 = vpack.c.bf16 %v75_v31, %v68_v30  ;;  %v82_v34 = vld [vmem:[%s5275_s0 + $0x1f0] sm:$0xff]  ;;  %vm3150_vm3 = vmpackc.low %vm479_vm2, %vm479_vm2 }
  0x18   :  { %215 = vmatprep.subr.mxu1 %v79_v60  ;;  %3099 = vmatpush1.bf16.msra.mxu0 %v3098_v59 }
  0x19   :  { %3101 = vmatprep.subr.bf16.mxu0 %v3100_v61 }
  0x1a   :  { %2813 = vmatmul.mubr.msk.f32.gmra.mrb[2].mxu0 %vm88_vm0, %v3452_v2 }
  0x1b   :  { %180 = vmatprep.mubr.f32.mxu0 %v3269_v3  ;;  %216 = vmatpush1.msra.mxu1 %v78_v4 }
  0x1c   :  { %2817 = vmatmul.mubr.msk.f32.vlgmr.msra.gmra.mrb[0].mxu1 %vm88_vm0, %v3429_v57  ;;  %3103 = vmatpush1.bf16.msra.mxu0 %v3102_v5 }
  0x1d   :  { %269 = vmatprep.mubr.f32.mxu1 %v3269_v3  ;;  %3105 = vmatprep.subr.bf16.mxu0 %v3104_v8 }
  0x1e   :  { %2814 = vmatmul.mubr.msk.f32.gmra.mrb[4].mxu0 %vm88_vm0, %v3481_v13  ;;  %3112 = vmatprep.subr.bf16.mxu1 %v3270_v21 }
  0x1f   :  { %186 = vmatprep.mubr.f32.mxu0 %v3269_v3  ;;  %3114 = vmatpush3.bf16.msra.mxu1 %v3113_v14 }
  0x20   :  { %2818 = vmatmul.mubr.msk.f32.gmra.mrb[2].mxu1 %vm88_vm0, %v3452_v2  ;;  %3107 = vmatpush1.bf16.msra.mxu0 %v3106_v15 }
  0x21   :  { %275 = vmatprep.mubr.f32.mxu1 %v3269_v3  ;;  %3109 = vmatprep.subr.bf16.mxu0 %v3108_v18 }
  0x22   :  { %2815 = vmatmul.mubr.msk.f32.gmra.mrb[6].mxu0 %vm88_vm0, %v86_v22  ;;  %3115 = vmatprep.subr.bf16.mxu1 %v3270_v21 }
  0x23   :  { %192 = vmatprep.mubr.f32.mxu0 %v3269_v3  ;;  %3117 = vmatpush3.bf16.msra.mxu1 %v3116_v23 }
  0x24   :  { %2819 = vmatmul.mubr.msk.f32.gmra.mrb[4].mxu1 %vm88_vm0, %v3481_v13  ;;  %3111 = vmatpush1.bf16.msra.mxu0 %v3110_v24 }
  0x25   :  { %281 = vmatprep.mubr.f32.mxu1 %v3269_v3  ;;  %310 = vmatprep.subr.mxu0 %v81_v27 }
  0x26   :  { %2816 = vmatmul.mubr.msk.f32.gmra.mrb[8].mxu0 %vm88_vm0, %v87_v28  ;;  %3118 = vmatprep.subr.bf16.mxu1 %v3270_v21 }
  0x27   :  { %358 = vmatprep.mubr.f32.mxu0 %v3269_v3  ;;  %3120 = vmatpush3.bf16.msra.mxu1 %v3119_v29 }
  0x28   :  { %2820 = vmatmul.mubr.msk.f32.gmra.mrb[6].mxu1 %vm88_vm0, %v86_v22  ;;  %311 = vmatpush1.msra.mxu0 %v80_v32 }
  0x29   :  { %287 = vmatprep.mubr.f32.mxu1 %v3269_v3  ;;  %3121 = vmatprep.subr.bf16.mxu1 %v3270_v21 }
  0x2a   :  { %2822 = vmatmul.mubr.msk.f32.vlgmr.msra.gmra.mrb[10].mxu0 %vm88_vm0, %v3429_v57 }
  0x2b   :  { %364 = vmatprep.mubr.f32.mxu0 %v3269_v3  ;;  %3123 = vmatpush3.bf16.msra.mxu1 %v3122_v33 }
  0x2c   :  { %2821 = vmatmul.mubr.msk.f32.gmra.mrb[8].mxu1 %vm88_vm0, %v87_v28  ;;  %2966 = vmatprep.subr.mxu1 %v3269_v3 }
  0x2d   :  { %2968 = vmatprep.mubr.msk.f32.mxu1 %vm3271_vm1, %v3269_v3 }
  0x2e   :  { %2823 = vmatmul.mubr.msk.f32.gmra.mrb[12].mxu0 %vm88_vm0, %v3452_v2 }
  0x2f   :  { %370 = vmatprep.mubr.f32.mxu0 %v3269_v3  ;;  %2967 = vmatpush3.msra.mxu1 %v82_v34 }
  0x30   :  { %2969 = vmatmul.mubr.msk.f32.vlgmr.msra.gmra.mrb[10].mxu1 %vm88_vm0, %v3429_v57 }
  0x31   :  { %2971 = vmatprep.mubr.msk.f32.mxu1 %vm3271_vm1, %v3269_v3 }
  0x32   :  { %2824 = vmatmul.mubr.msk.f32.gmra.mrb[14].mxu0 %vm88_vm0, %v3481_v13 }
  0x33   :  { %376 = vmatprep.mubr.f32.mxu0 %v3269_v3 }
  0x34   :  { %2972 = vmatmul.mubr.msk.f32.gmra.mrb[12].mxu1 %vm88_vm0, %v3452_v2 }
  0x35   :  { %2974 = vmatprep.mubr.msk.f32.mxu1 %vm3271_vm1, %v3269_v3 }
  0x36   :  { %2825 = vmatmul.mubr.msk.f32.gmra.mrb[16].mxu0 %vm88_vm0, %v86_v22 }
  0x37   :  { %382 = vmatprep.mubr.f32.mxu0 %v3269_v3 }
  0x38   :  { %2975 = vmatmul.mubr.msk.f32.gmra.mrb[14].mxu1 %vm88_vm0, %v3481_v13 }
  0x39   :  { %2977 = vmatprep.mubr.msk.f32.mxu1 %vm3271_vm1, %v3269_v3 }
  0x3a   :  { %2826 = vmatmul.mubr.msk.f32.gmra.mrb[18].mxu0 %vm88_vm0, %v87_v28 }
  0x3b   :  { %562 = vmatprep.mubr.f32.mxu0 %v3272_v35 }
  0x3c   :  { %2978 = vmatmul.mubr.msk.f32.gmra.mrb[16].mxu1 %vm88_vm0, %v86_v22 }
  0x3d   :  { %2980 = vmatprep.mubr.msk.f32.mxu1 %vm3271_vm1, %v3269_v3 }
  0x40   :  { %2981 = vmatmul.mubr.msk.f32.gmra.mrb[18].mxu1 %vm88_vm0, %v87_v28 }
  0x41   :  { %892 = vmatprep.mubr.f32.mxu1 %v3272_v35 }
  0xe9   :  { %v170_v36 = vpop.f32.mrb[0].mxu0 }
  0xea   :  { %v172_v37 = vpop.f32.mrb[1].mxu0  ;;  %v778_v39 = vmul.f32 %v170_v36, %v170_v36 }
  0xeb   :  { %v779_v43 = vmul.f32 %v172_v37, %v172_v37 }
  0xed   :  { %v176_v38 = vpop.f32.mrb[2].mxu0 }
  0xee   :  { %v3578_v40 = vpack.c.bf16 %v176_v38, %v170_v36  ;;  %v785_v41 = vmul.f32 %v176_v38, %v176_v38  ;;  %v178_v42 = vpop.f32.mrb[3].mxu0 }
  0xef   :  { %v3580_v44 = vpack.c.bf16 %v178_v42, %v172_v37  ;;  %v786_v45 = vmul.f32 %v178_v42, %v178_v42  ;;  %v265_v46 = vpop.f32.mrb[0].mxu1 }
  0xf0   :  { %v3158_v47 = vpack.c.bf16 %v785_v41, %v778_v39  ;;  %v267_v48 = vpop.f32.mrb[1].mxu1  ;;  %v3584_v52 = vmul.f32 %v265_v46, %v265_v46 }
  0xf1   :  { %v3156_v49 = vpack.c.bf16 %v786_v45, %v779_v43  ;;  %v182_v50 = vpop.f32.mrb[4].mxu0  ;;  %3125 = vmatprep.subr.bf16.mxu0 %v3580_v44  ;;  %v781_v53 = vmul.f32 %v267_v48, %v267_v48 }
  0xf2   :  { %v184_v51 = vpop.f32.mrb[5].mxu0  ;;  %3127 = vmatpush1.bf16.xpose.msra.mxu0 %v3578_v40  ;;  %v792_v61 = vmul.f32 %v182_v50, %v182_v50 }
  0xf3   :  { %3157 = vmatprep.subr.bf16.mxu1 %v3156_v49  ;;  %v271_v54 = vpop.f32.mrb[2].mxu1  ;;  %v793_v2 = vmul.f32 %v184_v51, %v184_v51 }
  0xf4   :  { %3159 = vmatpush1.bf16.xpose.msra.mxu1 %v3158_v47  ;;  %v3586_v55 = vpack.c.bf16 %v271_v54, %v265_v46  ;;  %v3588_v56 = vmul.f32 %v271_v54, %v271_v54  ;;  %v273_v57 = vpop.f32.mrb[3].mxu1 }
  0xf5   :  { %v188_v58 = vpop.f32.mrb[6].mxu0  ;;  %v3590_v59 = vpack.c.bf16 %v273_v57, %v267_v48  ;;  %v788_v60 = vmul.f32 %v273_v57, %v273_v57 }
  0xf6   :  { %v3592_v62 = vpack.c.bf16 %v188_v58, %v182_v50  ;;  %v799_v63 = vmul.f32 %v188_v58, %v188_v58  ;;  %v190_v0 = vpop.f32.mrb[7].mxu0  ;;  %v3166_v1 = vpack.c.bf16 %v3588_v56, %v3584_v52 }
  0xf7   :  { %v3596_v4 = vpack.c.bf16 %v190_v0, %v184_v51  ;;  %v800_v5 = vmul.f32 %v190_v0, %v190_v0  ;;  %v3164_v6 = vpack.c.bf16 %v788_v60, %v781_v53  ;;  %v277_v7 = vpop.f32.mrb[4].mxu1 }
  0xf8   :  { %v3162_v8 = vpack.c.bf16 %v799_v63, %v792_v61  ;;  %v279_v9 = vpop.f32.mrb[5].mxu1  ;;  %v3604_v13 = vmul.f32 %v277_v7, %v277_v7 }
  0xf9   :  { %v3160_v10 = vpack.c.bf16 %v800_v5, %v793_v2  ;;  %3129 = vmatprep.subr.bf16.mxu0 %v3596_v4  ;;  %v3599_v11 = vpop.f32.mrb[8].mxu0  ;;  %v795_v15 = vmul.f32 %v279_v9, %v279_v9 }
  0xfa   :  { %3131 = vmatpush1.bf16.xpose.msra.mxu0 %v3592_v62  ;;  %v3602_v12 = vpop.f32.mrb[9].mxu0  ;;  %v806_v32 = vmul.f32 %v3599_v11, %v3599_v11 }
  0xfb   :  { %3161 = vmatprep.subr.bf16.mxu1 %v3160_v10  ;;  %v807_v14 = vmul.f32 %v3602_v12, %v3602_v12  ;;  %506 = vmatprep.subr.mxu0 %v3602_v12  ;;  %v283_v16 = vpop.f32.mrb[6].mxu1 }
  0xfc   :  { %3163 = vmatpush1.bf16.xpose.msra.mxu1 %v3162_v8  ;;  %v3609_v17 = vpack.c.bf16 %v283_v16, %v277_v7  ;;  %v3611_v18 = vmul.f32 %v283_v16, %v283_v16  ;;  %v285_v19 = vpop.f32.mrb[7].mxu1 }
  0xfd   :  { %836 = vmatprep.subr.mxu1 %v807_v14  ;;  %v3613_v20 = vpack.c.bf16 %v285_v19, %v279_v9  ;;  %v802_v22 = vmul.f32 %v285_v19, %v285_v19  ;;  %v360_v23 = vpop.f32.mrb[10].mxu0 }
  0xfe   :  { %v3170_v24 = vpack.c.bf16 %v3611_v18, %v3604_v13  ;;  %v362_v25 = vpop.f32.mrb[11].mxu0  ;;  %v3619_v28 = vmul.f32 %v360_v23, %v360_v23 }
  0xff   :  { %v3168_v26 = vpack.c.bf16 %v802_v22, %v795_v15  ;;  %v3617_v27 = vpop.f32.mrb[8].mxu1  ;;  %v3623_v30 = vmul.f32 %v362_v25, %v362_v25 }
 0x100   :  { %v3621_v29 = vpop.f32.mrb[9].mxu1  ;;  %v808_v22 = vmul.f32 %v3617_v27, %v3617_v27 }
 0x101   :  { %v366_v31 = vpop.f32.mrb[12].mxu0  ;;  %v809_v5 = vmul.f32 %v3621_v29, %v3621_v29 }
 0x102   :  { %507 = vmatpush1.xpose.msra.mxu0 %v3599_v11  ;;  %v3628_v33 = vpack.c.bf16 %v366_v31, %v360_v23  ;;  %v3630_v34 = vmul.f32 %v366_v31, %v366_v31  ;;  %v368_v36 = vpop.f32.mrb[13].mxu0 }
 0x103   :  { %3133 = vmatprep.subr.bf16.mxu0 %v3590_v59  ;;  %v3633_v37 = vpack.c.bf16 %v368_v36, %v362_v25  ;;  %v790_v38 = vmul.f32 %v368_v36, %v368_v36  ;;  %v455_v39 = vpop.f32.mrb[10].mxu1 }
 0x104   :  { %837 = vmatpush1.xpose.msra.mxu1 %v806_v32  ;;  %v3174_v41 = vpack.c.bf16 %v3630_v34, %v3619_v28  ;;  %v2970_v42 = vpop.f32.mrb[11].mxu1  ;;  %v3641_v47 = vmul.f32 %v455_v39, %v455_v39  ;;  %v1117_v34 = vld [vmem:[%s5278_s3 + $0x8] sm:$0xff] }
 0x105   :  { %3165 = vmatprep.subr.bf16.mxu1 %v3164_v6  ;;  %563 = vmatmul.mubr.f32.vlgmr.msra.gmra.mrb[20].mxu0 %v3272_v35  ;;  %v3172_v43 = vpack.c.bf16 %v790_v38, %v3623_v30  ;;  %v372_v45 = vpop.f32.mrb[14].mxu0  ;;  %v1116_v30 = vld [vmem:[%s5278_s3] sm:$0xff]  ;;  %v1121_v42 = vld [vmem:[%s5278_s3 + $0x28] sm:$0xff] }
 0x106   :  { %3135 = vmatpush1.bf16.xpose.msra.mxu0 %v3586_v55  ;;  %v374_v46 = vpop.f32.mrb[15].mxu0  ;;  %632 = vmatprep.mubr.f32.mxu0 %v3272_v35  ;;  %v796_v49 = vmul.f32 %v372_v45, %v372_v45 }
 0x107   :  { %893 = vmatmul.mubr.f32.vlgmr.msra.gmra.mrb[20].mxu1 %v3272_v35  ;;  %3137 = vmatprep.subr.bf16.mxu0 %v3613_v20  ;;  %v460_v48 = vpop.f32.mrb[12].mxu1  ;;  %v797_v53 = vmul.f32 %v374_v46, %v374_v46 }
 0x108   :  { %3167 = vmatpush1.bf16.xpose.msra.mxu1 %v3166_v1  ;;  %962 = vmatprep.mubr.f32.mxu1 %v3272_v35  ;;  %v3646_v50 = vpack.c.bf16 %v460_v48, %v455_v39  ;;  %v791_v51 = vmul.f32 %v460_v48, %v460_v48  ;;  %v2973_v52 = vpop.f32.mrb[13].mxu1  ;;  %v1120_v39 = vld [vmem:[%s5278_s3 + $0x20] sm:$0xff] }
 0x109   :  { %3169 = vmatprep.subr.bf16.mxu1 %v3168_v26  ;;  %v378_v54 = vpop.f32.mrb[16].mxu0 }
 0x10a   :  { %v3648_v56 = vpack.c.bf16 %v378_v54, %v372_v45  ;;  %v803_v57 = vmul.f32 %v378_v54, %v378_v54  ;;  %v380_v58 = vpop.f32.mrb[17].mxu0  ;;  %v3181_v60 = vpack.c.bf16 %v791_v51, %v3641_v47  ;;  %v1122_v45 = vld [vmem:[%s5278_s3 + $0x30] sm:$0xff]  ;;  %v1123_v47 = vld [vmem:[%s5278_s3 + $0x38] sm:$0xff]  ;;  %v1125_v51 = vld [vmem:[%s5278_s3 + $0x48] sm:$0xff] }
 0x10b   :  { %v3651_v61 = vpack.c.bf16 %v380_v58, %v374_v46  ;;  %v804_v63 = vmul.f32 %v380_v58, %v380_v58  ;;  %v465_v0 = vpop.f32.mrb[14].mxu1  ;;  %v1128_v58 = vld [vmem:[%s5278_s3 + $0x60] sm:$0xff] }
 0x10c   :  { %v3178_v1 = vpack.c.bf16 %v803_v57, %v796_v49  ;;  %v2976_v2 = vpop.f32.mrb[15].mxu1  ;;  %v798_v9 = vmul.f32 %v465_v0, %v465_v0  ;;  %v1124_v49 = vld [vmem:[%s5278_s3 + $0x40] sm:$0xff] }
 0x10d   :  { %v3176_v6 = vpack.c.bf16 %v804_v63, %v797_v53  ;;  %v3655_v7 = vpop.f32.mrb[18].mxu0  ;;  %v1126_v53 = vld [vmem:[%s5278_s3 + $0x50] sm:$0xff] }
 0x10e   :  { %3139 = vmatpush1.bf16.xpose.msra.mxu0 %v3609_v17  ;;  %v3658_v8 = vpop.f32.mrb[19].mxu0 }
 0x10f   :  { %576 = vmatprep.subr.mxu0 %v3621_v29  ;;  %v470_v10 = vpop.f32.mrb[16].mxu1  ;;  %v811_v23 = vmul.f32 %v3658_v8, %v3658_v8 }
 0x110   :  { %3171 = vmatpush1.bf16.xpose.msra.mxu1 %v3170_v24  ;;  %v3661_v13 = vpack.c.bf16 %v470_v10, %v465_v0  ;;  %v805_v14 = vmul.f32 %v470_v10, %v470_v10  ;;  %v2979_v15 = vpop.f32.mrb[17].mxu1  ;;  %v810_v24 = vmul.f32 %v3655_v7, %v3655_v7  ;;  %v1130_v0 = vld [vmem:[%s5278_s3 + $0x70] sm:$0xff] }
 0x111   :  { %906 = vmatprep.subr.mxu1 %v809_v5 }
 0x112   :  { %v3185_v16 = vpack.c.bf16 %v805_v14, %v798_v9 }
 0x113   :  { %v3663_v18 = vpop.f32.mrb[18].mxu1 }
 0x114   :  { %v2982_v19 = vpop.f32.mrb[19].mxu1  ;;  %v812_v25 = vmul.f32 %v3663_v18, %v3663_v18 }
 0x116   :  { %577 = vmatpush1.xpose.msra.mxu0 %v3617_v27 }
 0x117   :  { %3141 = vmatprep.subr.bf16.mxu0 %v3633_v37 }
 0x118   :  { %907 = vmatpush1.xpose.msra.mxu1 %v808_v22 }
 0x119   :  { %3173 = vmatprep.subr.bf16.mxu1 %v3172_v43  ;;  %633 = vmatmul.mubr.f32.vlgmr.msra.gmra.mrb[20].mxu0 %v3272_v35 }
 0x11a   :  { %3143 = vmatpush1.bf16.xpose.msra.mxu0 %v3628_v33  ;;  %702 = vmatprep.mubr.f32.mxu0 %v3272_v35 }
 0x11b   :  { %963 = vmatmul.mubr.f32.vlgmr.msra.gmra.mrb[20].mxu1 %v3272_v35  ;;  %3145 = vmatprep.subr.bf16.mxu0 %v3651_v61 }
 0x11c   :  { %3175 = vmatpush1.bf16.xpose.msra.mxu1 %v3174_v41  ;;  %1032 = vmatprep.mubr.f32.mxu1 %v3272_v35 }
 0x11d   :  { %3177 = vmatprep.subr.bf16.mxu1 %v3176_v6 }
 0x122   :  { %3147 = vmatpush1.bf16.xpose.msra.mxu0 %v3648_v56 }
 0x123   :  { %646 = vmatprep.subr.mxu0 %v3658_v8 }
 0x124   :  { %3179 = vmatpush1.bf16.xpose.msra.mxu1 %v3178_v1 }
 0x125   :  { %976 = vmatprep.subr.mxu1 %v811_v23 }
 0x12a   :  { %647 = vmatpush1.xpose.msra.mxu0 %v3655_v7 }
 0x12b   :  { %3148 = vmatprep.subr.bf16.mxu0 %v3270_v21 }
 0x12c   :  { %977 = vmatpush1.xpose.msra.mxu1 %v810_v24 }
 0x12d   :  { %703 = vmatmul.mubr.f32.vlgmr.msra.gmra.mrb[20].mxu0 %v3272_v35  ;;  %3180 = vmatprep.subr.bf16.mxu1 %v3270_v21 }
 0x12e   :  { %3151 = vmatpush3.bf16.xpose.msk.msra.mxu0 %vm3150_vm3, %v3646_v50  ;;  %2993 = vmatprep.mubr.msk.f32.mxu0 %vm3271_vm1, %v3269_v3 }
 0x12f   :  { %1033 = vmatmul.mubr.f32.vlgmr.msra.gmra.mrb[20].mxu1 %v3272_v35  ;;  %3152 = vmatprep.subr.bf16.mxu0 %v3270_v21 }
 0x130   :  { %3183 = vmatpush3.bf16.xpose.msk.msra.mxu1 %vm3150_vm3, %v3181_v60  ;;  %3006 = vmatprep.mubr.msk.f32.mxu1 %vm3271_vm1, %v3269_v3 }
 0x131   :  { %3184 = vmatprep.subr.bf16.mxu1 %v3270_v21 }
 0x136   :  { %3155 = vmatpush3.bf16.xpose.msk.msra.mxu0 %vm3150_vm3, %v3661_v13 }
 0x137   :  { %2991 = vmatprep.subr.mxu0 %v3269_v3 }
 0x138   :  { %3187 = vmatpush3.bf16.xpose.msk.msra.mxu1 %vm3150_vm3, %v3185_v16 }
 0x139   :  { %3004 = vmatprep.subr.mxu1 %v3269_v3 }
 0x13e   :  { %2992 = vmatpush3.xpose.msk.msra.mxu0 %vm479_vm2, %v3663_v18 }
 0x13f   :  { %3189 = vmatprep.subr.bf16.mxu0 %v3580_v44 }
 0x140   :  { %3005 = vmatpush3.xpose.msk.msra.mxu1 %vm479_vm2, %v812_v25 }
 0x141   :  { %2994 = vmatmul.mubr.msk.f32.vlgmr.msra.gmra.mrb[20].mxu0 %vm479_vm2, %v3272_v35  ;;  %3197 = vmatprep.subr.bf16.mxu1 %v3590_v59 }
 0x142   :  { %3191 = vmatpush1.bf16.msra.mxu0 %v3578_v40  ;;  %1262 = vmatprep.mubr.f32.mxu0 %v3269_v3 }
 0x143   :  { %3007 = vmatmul.mubr.msk.f32.vlgmr.msra.gmra.mrb[20].mxu1 %vm479_vm2, %v3272_v35  ;;  %3193 = vmatprep.subr.bf16.mxu0 %v3596_v4 }
 0x144   :  { %3199 = vmatpush1.bf16.msra.mxu1 %v3586_v55  ;;  %1417 = vmatprep.mubr.f32.mxu1 %v3269_v3 }
 0x145   :  { %3201 = vmatprep.subr.bf16.mxu1 %v3613_v20 }
 0x146   :  { %3195 = vmatpush1.bf16.msra.mxu0 %v3592_v62 }
 0x147   :  { %1206 = vmatprep.subr.mxu0 %v3602_v12 }
 0x148   :  { %3203 = vmatpush1.bf16.msra.mxu1 %v3609_v17  ;;  %v1132_v17 = vlaneseq }
 0x149   :  { %1361 = vmatprep.subr.mxu1 %v3621_v29 }
 0x14a   :  { %1207 = vmatpush1.msra.mxu0 %v3599_v11  ;;  %v1133_v26 = vshrl.u32 %v1132_v17, 7  ;;  %v1112_v11 = vld [vmem:[%s5277_s2] sm:$0x1] }
 0x14b   :  { %3205 = vmatprep.subr.bf16.mxu0 %v3633_v37  ;;  %v1118_v37 = vld [vmem:[%s5278_s3 + $0x10] sm:$0xff] }
 0x14c   :  { %1362 = vmatpush1.msra.mxu1 %v3617_v27  ;;  %v1134_v28 = vsub.s32 0, %v1133_v26 }
 0x14d   :  { %3212 = vmatprep.subr.bf16.mxu1 %v3270_v21 }
 0x214   :  { %v774_v35 = vpop.f32.mrb[20].mxu0 }
 0x215   :  { %v1108_v40 = vmul.f32 0.0012755102, %v774_v35  ;;  %v2995_v44 = vpop.f32.mrb[21].mxu0 }
 0x216   :  { %v1104_v55 = vpop.f32.mrb[20].mxu1 }
 0x217   :  { %v1110_v59 = vmul.f32 %v1108_v40, %v1108_v40  ;;  %v1109_v62 = vmul.f32 0.0012755102, %v1104_v55  ;;  %v3008_v4 = vpop.f32.mrb[21].mxu1 }
 0x219   :  { %v1111_v12 = vsub.f32 %v1109_v62, %v1110_v59 }
 0x21b   :  { %v1113_v20 = vadd.f32 0.001, %v1111_v12 }
 0x21d   :  { %3237 = vrsqrt.f32 %v1113_v20 }
 0x227   :  { %v3238_v27 = vpop.eup %3237 }
 0x228   :  { %v1115_v29 = vmul.f32 %v3238_v27, %v1112_v11 }
 0x22a   :  { %v3729_v31 = vrot.slane %v1115_v29, %v1134_v28 }
 0x22c   :  { %v3732_v32 = vmul.f32 %v3729_v31, %v1116_v30  ;;  %v3746_v36 = vmul.f32 %v3729_v31, %v1117_v34  ;;  %v3790_v41 = vmul.f32 %v3729_v31, %v1120_v39  ;;  %v3802_v43 = vmul.f32 %v3729_v31, %v1121_v42 }
 0x22d   :  { %v3814_v46 = vmul.f32 %v3729_v31, %v1122_v45  ;;  %v3826_v48 = vmul.f32 %v3729_v31, %v1123_v47  ;;  %v3850_v52 = vmul.f32 %v3729_v31, %v1125_v51  ;;  %v3862_v54 = vmul.f32 %v3729_v31, %v1126_v53 }
 0x22e   :  { %2844 = vmatmul.mubr.msk.f32.vlgmr.msra.gmra.mrb[22].mxu0 %vm1152_vm4, %v3732_v32  ;;  %2859 = vmatmul.mubr.msk.f32.vlgmr.msra.gmra.mrb[22].mxu1 %vm1152_vm4, %v3732_v32  ;;  %v3886_v60 = vmul.f32 %v3729_v31, %v1128_v58  ;;  %v1151_v1 = vmul.f32 %v3729_v31, %v1130_v0 }
 0x22f   :  { %3207 = vmatpush1.bf16.msra.mxu0 %v3628_v33  ;;  %3214 = vmatpush3.bf16.msra.mxu1 %v3646_v50  ;;  %v1119_v33 = vld [vmem:[%s5278_s3 + $0x18] sm:$0xff]  ;;  %v3838_v50 = vmul.f32 %v3729_v31, %v1124_v49 }
 0x230   :  { %3209 = vmatprep.subr.bf16.mxu0 %v3651_v61  ;;  %1268 = vmatprep.mubr.f32.mxu0 %v3269_v3  ;;  %v3778_v38 = vmul.f32 %v3729_v31, %v1119_v33  ;;  %v1129_v61 = vld [vmem:[%s5278_s3 + $0x68] sm:$0xff] }
 0x231   :  { %1423 = vmatprep.mubr.f32.mxu1 %v3269_v3  ;;  %3215 = vmatprep.subr.bf16.mxu1 %v3270_v21  ;;  %v3762_v21 = vmul.f32 %v3729_v31, %v1118_v37  ;;  %v3898_v63 = vmul.f32 %v3729_v31, %v1129_v61 }
 0x232   :  { %2845 = vmatmul.mubr.msk.f32.gmra.mrb[24].mxu0 %vm1152_vm4, %v3746_v36  ;;  %2860 = vmatmul.mubr.msk.f32.gmra.mrb[24].mxu1 %vm1152_vm4, %v3746_v36 }
 0x233   :  { %3211 = vmatpush1.bf16.msra.mxu0 %v3648_v56  ;;  %3217 = vmatpush3.bf16.msra.mxu1 %v3661_v13  ;;  %v1127_v56 = vld [vmem:[%s5278_s3 + $0x58] sm:$0xff] }
 0x234   :  { %1516 = vmatprep.subr.mxu0 %v3658_v8  ;;  %1274 = vmatprep.mubr.f32.mxu0 %v3269_v3  ;;  %v3874_v57 = vmul.f32 %v3729_v31, %v1127_v56 }
 0x235   :  { %1429 = vmatprep.mubr.f32.mxu1 %v3269_v3  ;;  %3017 = vmatprep.subr.mxu1 %v3269_v3 }
 0x236   :  { %2846 = vmatmul.mubr.msk.f32.gmra.mrb[26].mxu0 %vm1152_vm4, %v3762_v21  ;;  %2861 = vmatmul.mubr.msk.f32.gmra.mrb[26].mxu1 %vm1152_vm4, %v3762_v21 }
 0x237   :  { %1517 = vmatpush1.msra.mxu0 %v3655_v7  ;;  %3018 = vmatpush3.msra.mxu1 %v3663_v18 }
 0x238   :  { %1280 = vmatprep.mubr.f32.mxu0 %v3269_v3  ;;  %1435 = vmatprep.mubr.f32.mxu1 %v3269_v3 }
 0x23a   :  { %2847 = vmatmul.mubr.msk.f32.gmra.mrb[28].mxu0 %vm1152_vm4, %v3778_v38  ;;  %2862 = vmatmul.mubr.msk.f32.gmra.mrb[28].mxu1 %vm1152_vm4, %v3778_v38 }
 0x23b   :  { %1286 = vmatprep.mubr.f32.mxu0 %v3269_v3  ;;  %1441 = vmatprep.mubr.f32.mxu1 %v3269_v3 }
 0x23e   :  { %2848 = vmatmul.mubr.msk.f32.gmra.mrb[30].mxu0 %vm1152_vm4, %v3790_v41  ;;  %2863 = vmatmul.mubr.msk.f32.gmra.mrb[30].mxu1 %vm1152_vm4, %v3790_v41 }
 0x23f   :  { %1292 = vmatprep.mubr.f32.mxu0 %v3269_v3  ;;  %1447 = vmatprep.mubr.f32.mxu1 %v3269_v3 }
 0x242   :  { %2849 = vmatmul.mubr.msk.f32.gmra.mrb[32].mxu0 %vm1152_vm4, %v3802_v43  ;;  %2864 = vmatmul.mubr.msk.f32.gmra.mrb[32].mxu1 %vm1152_vm4, %v3802_v43 }
 0x243   :  { %1298 = vmatprep.mubr.f32.mxu0 %v3269_v3  ;;  %1453 = vmatprep.mubr.f32.mxu1 %v3269_v3 }
 0x246   :  { %2850 = vmatmul.mubr.msk.f32.gmra.mrb[34].mxu0 %vm1152_vm4, %v3814_v46  ;;  %2865 = vmatmul.mubr.msk.f32.gmra.mrb[34].mxu1 %vm1152_vm4, %v3814_v46 }
 0x247   :  { %1304 = vmatprep.mubr.f32.mxu0 %v3269_v3  ;;  %1459 = vmatprep.mubr.f32.mxu1 %v3269_v3 }
 0x24a   :  { %2851 = vmatmul.mubr.msk.f32.gmra.mrb[36].mxu0 %vm1152_vm4, %v3826_v48  ;;  %2866 = vmatmul.mubr.msk.f32.gmra.mrb[36].mxu1 %vm1152_vm4, %v3826_v48 }
 0x24b   :  { %1310 = vmatprep.mubr.f32.mxu0 %v3269_v3  ;;  %1465 = vmatprep.mubr.f32.mxu1 %v3269_v3 }
 0x24e   :  { %2852 = vmatmul.mubr.msk.f32.gmra.mrb[38].mxu0 %vm1152_vm4, %v3838_v50  ;;  %2867 = vmatmul.mubr.msk.f32.gmra.mrb[38].mxu1 %vm1152_vm4, %v3838_v50 }
 0x24f   :  { %1316 = vmatprep.mubr.f32.mxu0 %v3269_v3  ;;  %1471 = vmatprep.mubr.f32.mxu1 %v3269_v3 }
 0x252   :  { %2853 = vmatmul.mubr.msk.f32.gmra.mrb[40].mxu0 %vm1152_vm4, %v3850_v52  ;;  %2868 = vmatmul.mubr.msk.f32.gmra.mrb[40].mxu1 %vm1152_vm4, %v3850_v52 }
 0x253   :  { %1322 = vmatprep.mubr.f32.mxu0 %v3269_v3  ;;  %1477 = vmatprep.mubr.f32.mxu1 %v3269_v3 }
 0x256   :  { %2854 = vmatmul.mubr.msk.f32.gmra.mrb[42].mxu0 %vm1152_vm4, %v3862_v54  ;;  %2869 = vmatmul.mubr.msk.f32.gmra.mrb[42].mxu1 %vm1152_vm4, %v3862_v54 }
 0x257   :  { %1328 = vmatprep.mubr.f32.mxu0 %v3269_v3  ;;  %1483 = vmatprep.mubr.f32.mxu1 %v3269_v3 }
 0x25a   :  { %2855 = vmatmul.mubr.msk.f32.gmra.mrb[44].mxu0 %vm1152_vm4, %v3874_v57  ;;  %2870 = vmatmul.mubr.msk.f32.gmra.mrb[44].mxu1 %vm1152_vm4, %v3874_v57 }
 0x25b   :  { %1334 = vmatprep.mubr.f32.mxu0 %v3269_v3  ;;  %1489 = vmatprep.mubr.f32.mxu1 %v3269_v3 }
 0x25e   :  { %2856 = vmatmul.mubr.msk.f32.gmra.mrb[46].mxu0 %vm1152_vm4, %v3886_v60  ;;  %2871 = vmatmul.mubr.msk.f32.gmra.mrb[46].mxu1 %vm1152_vm4, %v3886_v60 }
 0x25f   :  { %1340 = vmatprep.mubr.f32.mxu0 %v3269_v3  ;;  %1495 = vmatprep.mubr.f32.mxu1 %v3269_v3 }
 0x262   :  { %2857 = vmatmul.mubr.msk.f32.gmra.mrb[48].mxu0 %vm1152_vm4, %v3898_v63  ;;  %2872 = vmatmul.mubr.msk.f32.gmra.mrb[48].mxu1 %vm1152_vm4, %v3898_v63 }
 0x263   :  { %1346 = vmatprep.mubr.f32.mxu0 %v3269_v3  ;;  %1501 = vmatprep.mubr.f32.mxu1 %v3269_v3 }
 0x266   :  { %2858 = vmatmul.mubr.msk.f32.gmra.mrb[50].mxu0 %vm1152_vm4, %v1151_v1  ;;  %2873 = vmatmul.mubr.msk.f32.gmra.mrb[50].mxu1 %vm1152_vm4, %v1151_v1 }
 0x267   :  { %1572 = vmatprep.mubr.f32.mxu0 %v3269_v3  ;;  %3019 = vmatprep.mubr.msk.f32.mxu1 %vm3271_vm1, %v3269_v3 }
 0x26a   :  { %2874 = vmatmul.mubr.msk.f32.vlgmr.msra.gmra.mrb[52].mxu0 %vm1152_vm4, %v3732_v32  ;;  %3020 = vmatmul.mubr.msk.f32.vlgmr.msra.gmra.mrb[52].mxu1 %vm1152_vm4, %v3732_v32 }
 0x26b   :  { %1578 = vmatprep.mubr.f32.mxu0 %v3269_v3  ;;  %3022 = vmatprep.mubr.msk.f32.mxu1 %vm3271_vm1, %v3269_v3 }
 0x26e   :  { %2875 = vmatmul.mubr.msk.f32.gmra.mrb[54].mxu0 %vm1152_vm4, %v3746_v36  ;;  %3023 = vmatmul.mubr.msk.f32.gmra.mrb[54].mxu1 %vm1152_vm4, %v3746_v36 }
 0x26f   :  { %1584 = vmatprep.mubr.f32.mxu0 %v3269_v3  ;;  %3025 = vmatprep.mubr.msk.f32.mxu1 %vm3271_vm1, %v3269_v3 }
 0x272   :  { %2876 = vmatmul.mubr.msk.f32.gmra.mrb[56].mxu0 %vm1152_vm4, %v3762_v21  ;;  %3026 = vmatmul.mubr.msk.f32.gmra.mrb[56].mxu1 %vm1152_vm4, %v3762_v21 }
 0x273   :  { %1590 = vmatprep.mubr.f32.mxu0 %v3269_v3  ;;  %3028 = vmatprep.mubr.msk.f32.mxu1 %vm3271_vm1, %v3269_v3 }
 0x276   :  { %2877 = vmatmul.mubr.msk.f32.gmra.mrb[58].mxu0 %vm1152_vm4, %v3778_v38  ;;  %3029 = vmatmul.mubr.msk.f32.gmra.mrb[58].mxu1 %vm1152_vm4, %v3778_v38 }
 0x277   :  { %1596 = vmatprep.mubr.f32.mxu0 %v3269_v3  ;;  %3031 = vmatprep.mubr.msk.f32.mxu1 %vm3271_vm1, %v3269_v3 }
 0x27a   :  { %2878 = vmatmul.mubr.msk.f32.gmra.mrb[60].mxu0 %vm1152_vm4, %v3790_v41  ;;  %3032 = vmatmul.mubr.msk.f32.gmra.mrb[60].mxu1 %vm1152_vm4, %v3790_v41 }
 0x27b   :  { %1602 = vmatprep.mubr.f32.mxu0 %v3269_v3  ;;  %3034 = vmatprep.mubr.msk.f32.mxu1 %vm3271_vm1, %v3269_v3 }
 0x27e   :  { %2879 = vmatmul.mubr.msk.f32.gmra.mrb[62].mxu0 %vm1152_vm4, %v3802_v43  ;;  %3035 = vmatmul.mubr.msk.f32.gmra.mrb[62].mxu1 %vm1152_vm4, %v3802_v43 }
 0x27f   :  { %1608 = vmatprep.mubr.f32.mxu0 %v3269_v3  ;;  %3037 = vmatprep.mubr.msk.f32.mxu1 %vm3271_vm1, %v3269_v3 }
 0x282   :  { %2880 = vmatmul.mubr.msk.f32.gmra.mrb[64].mxu0 %vm1152_vm4, %v3814_v46  ;;  %3038 = vmatmul.mubr.msk.f32.gmra.mrb[64].mxu1 %vm1152_vm4, %v3814_v46 }
 0x283   :  { %1614 = vmatprep.mubr.f32.mxu0 %v3269_v3  ;;  %3040 = vmatprep.mubr.msk.f32.mxu1 %vm3271_vm1, %v3269_v3 }
 0x286   :  { %2881 = vmatmul.mubr.msk.f32.gmra.mrb[66].mxu0 %vm1152_vm4, %v3826_v48  ;;  %3041 = vmatmul.mubr.msk.f32.gmra.mrb[66].mxu1 %vm1152_vm4, %v3826_v48 }
 0x287   :  { %1620 = vmatprep.mubr.f32.mxu0 %v3269_v3  ;;  %3043 = vmatprep.mubr.msk.f32.mxu1 %vm3271_vm1, %v3269_v3 }
 0x28a   :  { %2882 = vmatmul.mubr.msk.f32.gmra.mrb[68].mxu0 %vm1152_vm4, %v3838_v50  ;;  %3044 = vmatmul.mubr.msk.f32.gmra.mrb[68].mxu1 %vm1152_vm4, %v3838_v50 }
 0x28b   :  { %1626 = vmatprep.mubr.f32.mxu0 %v3269_v3  ;;  %3046 = vmatprep.mubr.msk.f32.mxu1 %vm3271_vm1, %v3269_v3 }
 0x28e   :  { %2883 = vmatmul.mubr.msk.f32.gmra.mrb[70].mxu0 %vm1152_vm4, %v3850_v52  ;;  %3047 = vmatmul.mubr.msk.f32.gmra.mrb[70].mxu1 %vm1152_vm4, %v3850_v52 }
 0x28f   :  { %1632 = vmatprep.mubr.f32.mxu0 %v3269_v3  ;;  %3049 = vmatprep.mubr.msk.f32.mxu1 %vm3271_vm1, %v3269_v3 }
 0x292   :  { %2884 = vmatmul.mubr.msk.f32.gmra.mrb[72].mxu0 %vm1152_vm4, %v3862_v54  ;;  %3050 = vmatmul.mubr.msk.f32.gmra.mrb[72].mxu1 %vm1152_vm4, %v3862_v54 }
 0x293   :  { %1638 = vmatprep.mubr.f32.mxu0 %v3269_v3  ;;  %3052 = vmatprep.mubr.msk.f32.mxu1 %vm3271_vm1, %v3269_v3 }
 0x296   :  { %2885 = vmatmul.mubr.msk.f32.gmra.mrb[74].mxu0 %vm1152_vm4, %v3874_v57  ;;  %3053 = vmatmul.mubr.msk.f32.gmra.mrb[74].mxu1 %vm1152_vm4, %v3874_v57 }
 0x297   :  { %1644 = vmatprep.mubr.f32.mxu0 %v3269_v3  ;;  %3055 = vmatprep.mubr.msk.f32.mxu1 %vm3271_vm1, %v3269_v3 }
 0x29a   :  { %2886 = vmatmul.mubr.msk.f32.gmra.mrb[76].mxu0 %vm1152_vm4, %v3886_v60  ;;  %3056 = vmatmul.mubr.msk.f32.gmra.mrb[76].mxu1 %vm1152_vm4, %v3886_v60 }
 0x29b   :  { %1650 = vmatprep.mubr.f32.mxu0 %v3269_v3  ;;  %3058 = vmatprep.mubr.msk.f32.mxu1 %vm3271_vm1, %v3269_v3 }
 0x29e   :  { %2887 = vmatmul.mubr.msk.f32.gmra.mrb[78].mxu0 %vm1152_vm4, %v3898_v63  ;;  %3059 = vmatmul.mubr.msk.f32.gmra.mrb[78].mxu1 %vm1152_vm4, %v3898_v63 }
 0x29f   :  { %1656 = vmatprep.mubr.f32.mxu0 %v3269_v3  ;;  %3061 = vmatprep.mubr.msk.f32.mxu1 %vm3271_vm1, %v3269_v3 }
 0x2a2   :  { %2888 = vmatmul.mubr.msk.f32.gmra.mrb[80].mxu0 %vm1152_vm4, %v1151_v1  ;;  %3062 = vmatmul.mubr.msk.f32.gmra.mrb[80].mxu1 %vm1152_vm4, %v1151_v1 }
 0x301   :  { %v4015_v2 = vpop.f32.mrb[22].mxu0  ;;  %v4017_v5 = vpop.f32.mrb[22].mxu1 }
 0x302   :  { %v1953_v6 = vmul.f32 %v4015_v2, %v4015_v2  ;;  %v4021_v7 = vpop.f32.mrb[23].mxu0  ;;  %v4023_v8 = vpop.f32.mrb[23].mxu1  ;;  %v1955_v10 = vmul.f32 %v4017_v5, %v4017_v5 }
 0x303   :  { %v1803_v9 = vadd.f32 %v4021_v7, %v4015_v2  ;;  %v1954_v3 = vmul.f32 %v4021_v7, %v4021_v7  ;;  %v1956_v18 = vmul.f32 %v4023_v8, %v4023_v8 }
 0x305   :  { %v2058_v13 = vadd.f32 %v1954_v3, %v1953_v6  ;;  %v1804_v14 = vadd.f32 %v1803_v9, %v4017_v5  ;;  %v4032_v15 = vpop.f32.mrb[24].mxu0  ;;  %v4034_v16 = vpop.f32.mrb[24].mxu1 }
 0x306   :  { %v1960_v19 = vmul.f32 %v4032_v15, %v4032_v15  ;;  %v4040_v22 = vpop.f32.mrb[25].mxu0  ;;  %v4042_v23 = vpop.f32.mrb[25].mxu1  ;;  %v1962_v55 = vmul.f32 %v4034_v16, %v4034_v16 }
 0x307   :  { %v4045_v24 = vadd.f32 %v1804_v14, %v4023_v8  ;;  %v2059_v25 = vadd.f32 %v2058_v13, %v1955_v10  ;;  %v1812_v35 = vadd.f32 %v4040_v22, %v4032_v15  ;;  %v1961_v40 = vmul.f32 %v4040_v22, %v4040_v22 }
 0x308   :  { %v1963_v20 = vmul.f32 %v4042_v23, %v4042_v23 }
 0x309   :  { %v4051_v44 = vadd.f32 %v2059_v25, %v1956_v18  ;;  %v2067_v59 = vadd.f32 %v1961_v40, %v1960_v19  ;;  %v1813_v62 = vadd.f32 %v1812_v35, %v4034_v16  ;;  %v4056_v4 = vpop.f32.mrb[26].mxu0  ;;  %v4058_v12 = vpop.f32.mrb[26].mxu1 }
 0x30a   :  { %v1967_v17 = vmul.f32 %v4056_v4, %v4056_v4  ;;  %v4064_v26 = vpop.f32.mrb[27].mxu0  ;;  %v4066_v11 = vpop.f32.mrb[27].mxu1  ;;  %v1969_v32 = vmul.f32 %v4058_v12, %v4058_v12 }
 0x30b   :  { %v4069_v28 = vadd.f32 %v1813_v62, %v4042_v23  ;;  %v2068_v27 = vadd.f32 %v2067_v59, %v1962_v55  ;;  %v1821_v29 = vadd.f32 %v4064_v26, %v4056_v4  ;;  %v1968_v30 = vmul.f32 %v4064_v26, %v4064_v26 }
 0x30c   :  { %v1970_v33 = vmul.f32 %v4066_v11, %v4066_v11 }
 0x30d   :  { %v4075_v31 = vadd.f32 %v2068_v27, %v1963_v20  ;;  %v2076_v34 = vadd.f32 %v1968_v30, %v1967_v17  ;;  %v1822_v36 = vadd.f32 %v1821_v29, %v4058_v12  ;;  %v4080_v37 = vpop.f32.mrb[28].mxu0  ;;  %v4082_v21 = vpop.f32.mrb[28].mxu1 }
 0x30e   :  { %5352 = vst [vmem:[#allocation2_spill] sm:$0xff] %v4080_v37  ;;  %5353 = vst [vmem:[#allocation3_spill] sm:$0xff] %v4082_v21  ;;  %v1974_v38 = vmul.f32 %v4080_v37, %v4080_v37  ;;  %v4088_v39 = vpop.f32.mrb[29].mxu0  ;;  %v4090_v41 = vpop.f32.mrb[29].mxu1  ;;  %v1976_v48 = vmul.f32 %v4082_v21, %v4082_v21 }
 0x30f   :  { %5354 = vst [vmem:[#allocation4_spill] sm:$0xff] %v4088_v39  ;;  %5355 = vst [vmem:[#allocation5_spill] sm:$0xff] %v4090_v41  ;;  %v4093_v42 = vadd.f32 %v1822_v36, %v4066_v11  ;;  %v2077_v43 = vadd.f32 %v2076_v34, %v1969_v32  ;;  %v1830_v45 = vadd.f32 %v4088_v39, %v4080_v37 }
 0x310   :  { %v1975_v46 = vmul.f32 %v4088_v39, %v4088_v39  ;;  %v1977_v53 = vmul.f32 %v4090_v41, %v4090_v41 }
 0x311   :  { %v4099_v47 = vadd.f32 %v2077_v43, %v1970_v33  ;;  %v1831_v50 = vadd.f32 %v1830_v45, %v4082_v21  ;;  %v4104_v51 = vpop.f32.mrb[30].mxu0  ;;  %v4106_v52 = vpop.f32.mrb[30].mxu1 }
 0x312   :  { %v2085_v49 = vadd.f32 %v1975_v46, %v1974_v38  ;;  %5356 = vst [vmem:[#allocation6_spill] sm:$0xff] %v4104_v51  ;;  %5357 = vst [vmem:[#allocation7_spill] sm:$0xff] %v4106_v52  ;;  %v1981_v54 = vmul.f32 %v4104_v51, %v4104_v51  ;;  %v4112_v56 = vpop.f32.mrb[31].mxu0  ;;  %v4114_v57 = vpop.f32.mrb[31].mxu1  ;;  %v1983_v1 = vmul.f32 %v4106_v52, %v4106_v52 }
 0x313   :  { %5358 = vst [vmem:[#allocation8_spill] sm:$0xff] %v4112_v56  ;;  %5359 = vst [vmem:[#allocation9_spill] sm:$0xff] %v4114_v57  ;;  %v4117_v58 = vadd.f32 %v1831_v50, %v4090_v41  ;;  %v1839_v61 = vadd.f32 %v4112_v56, %v4104_v51  ;;  %v1982_v63 = vmul.f32 %v4112_v56, %v4112_v56 }
 0x314   :  { %v2086_v60 = vadd.f32 %v2085_v49, %v1976_v48  ;;  %v1984_v13 = vmul.f32 %v4114_v57, %v4114_v57 }
 0x315   :  { %v2094_v6 = vadd.f32 %v1982_v63, %v1981_v54  ;;  %v1840_v9 = vadd.f32 %v1839_v61, %v4106_v52  ;;  %v4128_v3 = vpop.f32.mrb[32].mxu0  ;;  %v4130_v10 = vpop.f32.mrb[32].mxu1 }
 0x316   :  { %v4123_v0 = vadd.f32 %v2086_v60, %v1977_v53  ;;  %5360 = vst [vmem:[#allocation10_spill] sm:$0xff] %v4128_v3  ;;  %5361 = vst [vmem:[#allocation11_spill] sm:$0xff] %v4130_v10  ;;  %v1988_v14 = vmul.f32 %v4128_v3, %v4128_v3  ;;  %v4136_v18 = vpop.f32.mrb[33].mxu0  ;;  %v4138_v19 = vpop.f32.mrb[33].mxu1  ;;  %v1990_v62 = vmul.f32 %v4130_v10, %v4130_v10 }
 0x317   :  { %5362 = vst [vmem:[#allocation12_spill] sm:$0xff] %v4136_v18  ;;  %5363 = vst [vmem:[#allocation13_spill] sm:$0xff] %v4138_v19  ;;  %v4141_v25 = vadd.f32 %v1840_v9, %v4114_v57  ;;  %v2095_v35 = vadd.f32 %v2094_v6, %v1983_v1  ;;  %v1848_v40 = vadd.f32 %v4136_v18, %v4128_v3 }
 0x318   :  { %v1989_v55 = vmul.f32 %v4136_v18, %v4136_v18  ;;  %v1991_v30 = vmul.f32 %v4138_v19, %v4138_v19 }
 0x319   :  { %v4147_v59 = vadd.f32 %v2095_v35, %v1984_v13  ;;  %v1849_v17 = vadd.f32 %v1848_v40, %v4130_v10  ;;  %v4152_v27 = vpop.f32.mrb[34].mxu0  ;;  %v4154_v29 = vpop.f32.mrb[34].mxu1 }
 0x31a   :  { %v2103_v20 = vadd.f32 %v1989_v55, %v1988_v14  ;;  %5364 = vst [vmem:[#allocation14_spill] sm:$0xff] %v4152_v27  ;;  %5365 = vst [vmem:[#allocation15_spill] sm:$0xff] %v4154_v29  ;;  %v1995_v32 = vmul.f32 %v4152_v27, %v4152_v27  ;;  %v4160_v34 = vpop.f32.mrb[35].mxu0  ;;  %v4162_v36 = vpop.f32.mrb[35].mxu1  ;;  %v1997_v48 = vmul.f32 %v4154_v29, %v4154_v29 }
 0x31b   :  { %5366 = vst [vmem:[#allocation16_spill] sm:$0xff] %v4160_v34  ;;  %5367 = vst [vmem:[#allocation17_spill] sm:$0xff] %v4162_v36  ;;  %v4165_v33 = vadd.f32 %v1849_v17, %v4138_v19  ;;  %v1857_v43 = vadd.f32 %v4160_v34, %v4152_v27  ;;  %v1996_v45 = vmul.f32 %v4160_v34, %v4160_v34 }
 0x31c   :  { %v2104_v38 = vadd.f32 %v2103_v20, %v1990_v62  ;;  %v1998_v60 = vmul.f32 %v4162_v36, %v4162_v36 }
 0x31d   :  { %v2112_v49 = vadd.f32 %v1996_v45, %v1995_v32  ;;  %v1858_v50 = vadd.f32 %v1857_v43, %v4154_v29  ;;  %v4176_v53 = vpop.f32.mrb[36].mxu0  ;;  %v4178_v54 = vpop.f32.mrb[36].mxu1 }
 0x31e   :  { %v4171_v46 = vadd.f32 %v2104_v38, %v1991_v30  ;;  %5368 = vst [vmem:[#allocation18_spill] sm:$0xff] %v4176_v53  ;;  %5369 = vst [vmem:[#allocation19_spill] sm:$0xff] %v4178_v54  ;;  %v2002_v61 = vmul.f32 %v4176_v53, %v4176_v53  ;;  %v4184_v63 = vpop.f32.mrb[37].mxu0  ;;  %v4186_v1 = vpop.f32.mrb[37].mxu1  ;;  %v2004_v40 = vmul.f32 %v4178_v54, %v4178_v54 }
 0x31f   :  { %5370 = vst [vmem:[#allocation20_spill] sm:$0xff] %v4184_v63  ;;  %5371 = vst [vmem:[#allocation21_spill] sm:$0xff] %v4186_v1  ;;  %v4189_v6 = vadd.f32 %v1858_v50, %v4162_v36  ;;  %v2113_v9 = vadd.f32 %v2112_v49, %v1997_v48  ;;  %v1866_v13 = vadd.f32 %v4184_v63, %v4176_v53 }
 0x320   :  { %v2003_v14 = vmul.f32 %v4184_v63, %v4184_v63  ;;  %v2005_v30 = vmul.f32 %v4186_v1, %v4186_v1 }
 0x321   :  { %v4195_v35 = vadd.f32 %v2113_v9, %v1998_v60  ;;  %v1867_v62 = vadd.f32 %v1866_v13, %v4178_v54  ;;  %v4200_v20 = vpop.f32.mrb[38].mxu0  ;;  %v4202_v17 = vpop.f32.mrb[38].mxu1 }
 0x322   :  { %v2121_v55 = vadd.f32 %v2003_v14, %v2002_v61  ;;  %5372 = vst [vmem:[#allocation22_spill] sm:$0xff] %v4200_v20  ;;  %5373 = vst [vmem:[#allocation23_spill] sm:$0xff] %v4202_v17  ;;  %v2009_v32 = vmul.f32 %v4200_v20, %v4200_v20  ;;  %v4208_v38 = vpop.f32.mrb[39].mxu0  ;;  %v4210_v43 = vpop.f32.mrb[39].mxu1  ;;  %v2011_v61 = vmul.f32 %v4202_v17, %v4202_v17 }
 0x323   :  { %5374 = vst [vmem:[#allocation24_spill] sm:$0xff] %v4208_v38  ;;  %5375 = vst [vmem:[#allocation25_spill] sm:$0xff] %v4210_v43  ;;  %v4213_v45 = vadd.f32 %v1867_v62, %v4186_v1  ;;  %v1875_v49 = vadd.f32 %v4208_v38, %v4200_v20  ;;  %v2010_v50 = vmul.f32 %v4208_v38, %v4208_v38 }
 0x324   :  { %v2122_v48 = vadd.f32 %v2121_v55, %v2004_v40  ;;  %v2012_v40 = vmul.f32 %v4210_v43, %v4210_v43 }
 0x325   :  { %v2130_v9 = vadd.f32 %v2010_v50, %v2009_v32  ;;  %v1876_v13 = vadd.f32 %v1875_v49, %v4202_v17  ;;  %v4224_v14 = vpop.f32.mrb[40].mxu0  ;;  %v4226_v54 = vpop.f32.mrb[40].mxu1 }
 0x326   :  { %v4219_v60 = vadd.f32 %v2122_v48, %v2005_v30  ;;  %5376 = vst [vmem:[#allocation26_spill] sm:$0xff] %v4224_v14  ;;  %5377 = vst [vmem:[#allocation27_spill] sm:$0xff] %v4226_v54  ;;  %v2016_v55 = vmul.f32 %v4224_v14, %v4224_v14  ;;  %v4232_v62 = vpop.f32.mrb[41].mxu0  ;;  %v4234_v30 = vpop.f32.mrb[41].mxu1  ;;  %v2018_v63 = vmul.f32 %v4226_v54, %v4226_v54 }
 0x327   :  { %5378 = vst [vmem:[#allocation28_spill] sm:$0xff] %v4232_v62  ;;  %5379 = vst [vmem:[#allocation29_spill] sm:$0xff] %v4234_v30  ;;  %v4237_v48 = vadd.f32 %v1876_v13, %v4210_v43  ;;  %v2131_v32 = vadd.f32 %v2130_v9, %v2011_v61  ;;  %v1884_v49 = vadd.f32 %v4232_v62, %v4224_v14 }
 0x328   :  { %v2017_v50 = vmul.f32 %v4232_v62, %v4232_v62  ;;  %v2019_v61 = vmul.f32 %v4234_v30, %v4234_v30 }
 0x329   :  { %v4243_v1 = vadd.f32 %v2131_v32, %v2012_v40  ;;  %v1885_v17 = vadd.f32 %v1884_v49, %v4226_v54  ;;  %v4248_v38 = vpop.f32.mrb[42].mxu0  ;;  %v4250_v20 = vpop.f32.mrb[42].mxu1 }
 0x32a   :  { %v2139_v53 = vadd.f32 %v2017_v50, %v2016_v55  ;;  %5380 = vst [vmem:[#allocation30_spill] sm:$0xff] %v4248_v38  ;;  %5381 = vst [vmem:[#allocation31_spill] sm:$0xff] %v4250_v20  ;;  %v2023_v9 = vmul.f32 %v4248_v38, %v4248_v38  ;;  %v4256_v13 = vpop.f32.mrb[43].mxu0  ;;  %v4258_v40 = vpop.f32.mrb[43].mxu1  ;;  %v2025_v62 = vmul.f32 %v4250_v20, %v4250_v20 }
 0x32b   :  { %5382 = vst [vmem:[#allocation32_spill] sm:$0xff] %v4256_v13  ;;  %5383 = vst [vmem:[#allocation33_spill] sm:$0xff] %v4258_v40  ;;  %v4261_v32 = vadd.f32 %v1885_v17, %v4234_v30  ;;  %v1893_v49 = vadd.f32 %v4256_v13, %v4248_v38  ;;  %v2024_v50 = vmul.f32 %v4256_v13, %v4256_v13 }
 0x32c   :  { %v2140_v55 = vadd.f32 %v2139_v53, %v2018_v63  ;;  %v2026_v53 = vmul.f32 %v4258_v40, %v4258_v40 }
 0x32d   :  { %v2148_v43 = vadd.f32 %v2024_v50, %v2023_v9  ;;  %v1894_v14 = vadd.f32 %v1893_v49, %v4250_v20  ;;  %v4272_v36 = vpop.f32.mrb[44].mxu0  ;;  %v4274_v29 = vpop.f32.mrb[44].mxu1 }
 0x32e   :  { %v4267_v54 = vadd.f32 %v2140_v55, %v2019_v61  ;;  %5384 = vst [vmem:[#allocation34_spill] sm:$0xff] %v4272_v36  ;;  %5385 = vst [vmem:[#allocation35_spill] sm:$0xff] %v4274_v29  ;;  %v2030_v63 = vmul.f32 %v4272_v36, %v4272_v36  ;;  %v4280_v17 = vpop.f32.mrb[45].mxu0  ;;  %v4282_v61 = vpop.f32.mrb[45].mxu1  ;;  %v2032_v13 = vmul.f32 %v4274_v29, %v4274_v29 }
 0x32f   :  { %5386 = vst [vmem:[#allocation36_spill] sm:$0xff] %v4280_v17  ;;  %5387 = vst [vmem:[#allocation37_spill] sm:$0xff] %v4282_v61  ;;  %v4285_v55 = vadd.f32 %v1894_v14, %v4258_v40  ;;  %v2149_v9 = vadd.f32 %v2148_v43, %v2025_v62  ;;  %v1902_v49 = vadd.f32 %v4280_v17, %v4272_v36 }
 0x330   :  { %v2031_v50 = vmul.f32 %v4280_v17, %v4280_v17  ;;  %v2033_v43 = vmul.f32 %v4282_v61, %v4282_v61 }
 0x331   :  { %v4291_v20 = vadd.f32 %v2149_v9, %v2026_v53  ;;  %v1903_v30 = vadd.f32 %v1902_v49, %v4274_v29  ;;  %v4296_v34 = vpop.f32.mrb[46].mxu0  ;;  %v4298_v27 = vpop.f32.mrb[46].mxu1 }
 0x332   :  { %v2157_v38 = vadd.f32 %v2031_v50, %v2030_v63  ;;  %5388 = vst [vmem:[#allocation38_spill] sm:$0xff] %v4296_v34  ;;  %5389 = vst [vmem:[#allocation39_spill] sm:$0xff] %v4298_v27  ;;  %v2037_v14 = vmul.f32 %v4296_v34, %v4296_v34  ;;  %v4304_v62 = vpop.f32.mrb[47].mxu0  ;;  %v4306_v53 = vpop.f32.mrb[47].mxu1  ;;  %v2039_v17 = vmul.f32 %v4298_v27, %v4298_v27 }
 0x333   :  { %5390 = vst [vmem:[#allocation40_spill] sm:$0xff] %v4304_v62  ;;  %5391 = vst [vmem:[#allocation41_spill] sm:$0xff] %v4306_v53  ;;  %v4309_v9 = vadd.f32 %v1903_v30, %v4282_v61  ;;  %v1911_v49 = vadd.f32 %v4304_v62, %v4296_v34  ;;  %v2038_v50 = vmul.f32 %v4304_v62, %v4304_v62 }
 0x334   :  { %v2158_v63 = vadd.f32 %v2157_v38, %v2032_v13  ;;  %v2040_v38 = vmul.f32 %v4306_v53, %v4306_v53 }
 0x335   :  { %v2166_v36 = vadd.f32 %v2038_v50, %v2037_v14  ;;  %v1912_v40 = vadd.f32 %v1911_v49, %v4298_v27  ;;  %v4320_v19 = vpop.f32.mrb[48].mxu0  ;;  %v4322_v10 = vpop.f32.mrb[48].mxu1 }
 0x336   :  { %v4315_v29 = vadd.f32 %v2158_v63, %v2033_v43  ;;  %5392 = vst [vmem:[#allocation42_spill] sm:$0xff] %v4320_v19  ;;  %5393 = vst [vmem:[#allocation43_spill] sm:$0xff] %v4322_v10  ;;  %v2044_v30 = vmul.f32 %v4320_v19, %v4320_v19  ;;  %v4328_v13 = vpop.f32.mrb[49].mxu0  ;;  %v4330_v43 = vpop.f32.mrb[49].mxu1  ;;  %v2046_v62 = vmul.f32 %v4322_v10, %v4322_v10 }
 0x337   :  { %5394 = vst [vmem:[#allocation44_spill] sm:$0xff] %v4328_v13  ;;  %5395 = vst [vmem:[#allocation45_spill] sm:$0xff] %v4330_v43  ;;  %v4333_v63 = vadd.f32 %v1912_v40, %v4306_v53  ;;  %v2167_v14 = vadd.f32 %v2166_v36, %v2039_v17  ;;  %v1920_v49 = vadd.f32 %v4328_v13, %v4320_v19 }
 0x338   :  { %v2045_v50 = vmul.f32 %v4328_v13, %v4328_v13  ;;  %v2047_v36 = vmul.f32 %v4330_v43, %v4330_v43 }
 0x339   :  { %v4339_v27 = vadd.f32 %v2167_v14, %v2040_v38  ;;  %v1921_v61 = vadd.f32 %v1920_v49, %v4322_v10  ;;  %v4344_v18 = vpop.f32.mrb[50].mxu0  ;;  %v4346_v3 = vpop.f32.mrb[50].mxu1 }
 0x33a   :  { %v2175_v34 = vadd.f32 %v2045_v50, %v2044_v30  ;;  %5396 = vst [vmem:[#allocation46_spill] sm:$0xff] %v4344_v18  ;;  %5397 = vst [vmem:[#allocation47_spill] sm:$0xff] %v4346_v3  ;;  %v2051_v40 = vmul.f32 %v4344_v18, %v4344_v18  ;;  %v4352_v17 = vpop.f32.mrb[51].mxu0  ;;  %v4354_v38 = vpop.f32.mrb[51].mxu1  ;;  %v2053_v13 = vmul.f32 %v4346_v3, %v4346_v3 }
 0x33b   :  { %5398 = vst [vmem:[#allocation48_spill] sm:$0xff] %v4352_v17  ;;  %5399 = vst [vmem:[#allocation49_spill] sm:$0xff] %v4354_v38  ;;  %v4357_v14 = vadd.f32 %v1921_v61, %v4330_v43  ;;  %v1929_v49 = vadd.f32 %v4352_v17, %v4344_v18  ;;  %v2052_v50 = vmul.f32 %v4352_v17, %v4352_v17 }
 0x33c   :  { %v2176_v30 = vadd.f32 %v2175_v34, %v2046_v62 }
 0x33d   :  { %v2184_v19 = vadd.f32 %v2052_v50, %v2051_v40  ;;  %v1930_v53 = vadd.f32 %v1929_v49, %v4346_v3  ;;  %v4368_v57 = vpop.f32.mrb[52].mxu0  ;;  %v4370_v52 = vpop.f32.mrb[52].mxu1  ;;  %v2054_v40 = vmul.f32 %v4354_v38, %v4354_v38 }
 0x33e   :  { %v4363_v10 = vadd.f32 %v2176_v30, %v2047_v36  ;;  %v1806_v34 = vadd.f32 %v4045_v24, %v4368_v57  ;;  %v1957_v61 = vmul.f32 %v4368_v57, %v4368_v57  ;;  %v4376_v62 = vpop.f32.mrb[53].mxu0  ;;  %v3021_v36 = vpop.f32.mrb[53].mxu1  ;;  %v1959_v24 = vmul.f32 %v4370_v52, %v4370_v52 }
 0x33f   :  { %v4379_v30 = vadd.f32 %v1930_v53, %v4354_v38  ;;  %v2185_v49 = vadd.f32 %v2184_v19, %v2053_v13  ;;  %v1958_v50 = vmul.f32 %v4376_v62, %v4376_v62  ;;  %v1808_v38 = vsel %vm479_vm2, %v4370_v52, 0.0 }
 0x340   :  { %v1807_v3 = vadd.f32 %v1806_v34, %v4376_v62  ;;  %v2061_v17 = vadd.f32 %v4051_v44, %v1957_v61 }
 0x341   :  { %v4389_v18 = vadd.f32 %v2185_v49, %v2054_v40  ;;  %v4391_v36 = vpop.f32.mrb[54].mxu0  ;;  %v4393_v53 = vpop.f32.mrb[54].mxu1  ;;  %v2063_v49 = vsel %vm479_vm2, %v1959_v24, 0.0 }
 0x342   :  { %v1815_v19 = vadd.f32 %v4069_v28, %v4391_v36  ;;  %v1964_v13 = vmul.f32 %v4391_v36, %v4391_v36  ;;  %v4401_v34 = vpop.f32.mrb[55].mxu0  ;;  %v3024_v43 = vpop.f32.mrb[55].mxu1  ;;  %v1809_v56 = vadd.f32 %v1808_v38, %v1807_v3  ;;  %v2062_v61 = vadd.f32 %v2061_v17, %v1958_v50 }
 0x343   :  { %v1965_v44 = vmul.f32 %v4401_v34, %v4401_v34  ;;  %v1966_v40 = vmul.f32 %v4393_v53, %v4393_v53  ;;  %v1817_v3 = vsel %vm479_vm2, %v4393_v53, 0.0 }
 0x344   :  { %1810 = vadd.xlane.f32.xlu0 %v1809_v56  ;;  %v1816_v51 = vadd.f32 %v1815_v19, %v4401_v34  ;;  %v2070_v28 = vadd.f32 %v4075_v31, %v1964_v13  ;;  %v2064_v43 = vadd.f32 %v2063_v49, %v2062_v61 }
 0x345   :  { %v4410_v41 = vpop.f32.mrb[56].mxu0  ;;  %v4412_v21 = vpop.f32.mrb[56].mxu1  ;;  %v2072_v61 = vsel %vm479_vm2, %v1966_v40, 0.0 }
 0x346   :  { %v1824_v17 = vadd.f32 %v4093_v42, %v4410_v41  ;;  %v1971_v56 = vmul.f32 %v4410_v41, %v4410_v41  ;;  %v3027_v38 = vpop.f32.mrb[57].mxu1  ;;  %v4420_v50 = vpop.f32.mrb[57].mxu0  ;;  %v1818_v24 = vadd.f32 %v1817_v3, %v1816_v51  ;;  %2065 = vadd.xlane.f32.xlu1 %v2064_v43  ;;  %v2071_v19 = vadd.f32 %v2070_v28, %v1965_v44 }
 0x347   :  { %v1972_v31 = vmul.f32 %v4420_v50, %v4420_v50  ;;  %v1973_v13 = vmul.f32 %v4412_v21, %v4412_v21  ;;  %v1826_v43 = vsel %vm479_vm2, %v4412_v21, 0.0 }
 0x348   :  { %1819 = vadd.xlane.f32.xlu0 %v1818_v24  ;;  %v1825_v42 = vadd.f32 %v1824_v17, %v4420_v50  ;;  %v2079_v49 = vadd.f32 %v4099_v47, %v1971_v56  ;;  %v2073_v51 = vadd.f32 %v2072_v61, %v2071_v19 }
 0x349   :  { %v4429_v39 = vpop.f32.mrb[58].mxu0  ;;  %v4431_v38 = vpop.f32.mrb[58].mxu1  ;;  %v2081_v19 = vsel %vm479_vm2, %v1973_v13, 0.0 }
 0x34a   :  { %5400 = vst [vmem:[#allocation50_spill] sm:$0xff] %v4429_v39  ;;  %5401 = vst [vmem:[#allocation51_spill] sm:$0xff] %v4431_v38  ;;  %v1833_v44 = vadd.f32 %v4117_v58, %v4429_v39  ;;  %v1978_v28 = vmul.f32 %v4429_v39, %v4429_v39  ;;  %v4439_v3 = vpop.f32.mrb[59].mxu0  ;;  %v3030_v40 = vpop.f32.mrb[59].mxu1  ;;  %v1827_v17 = vadd.f32 %v1826_v43, %v1825_v42 }
 0x34b   :  { %v1980_v47 = vmul.f32 %v4431_v38, %v4431_v38  ;;  %v1979_v56 = vmul.f32 %v4439_v3, %v4439_v3  ;;  %v2080_v24 = vadd.f32 %v2079_v49, %v1972_v31 }
 0x34c   :  { %2074 = vadd.xlane.f32.xlu0 %v2073_v51  ;;  %1828 = vadd.xlane.f32.xlu1 %v1827_v17  ;;  %v2088_v58 = vadd.f32 %v4123_v0, %v1978_v28  ;;  %v1834_v61 = vadd.f32 %v1833_v44, %v4439_v3  ;;  %v1835_v0 = vsel %vm479_vm2, %v4431_v38, 0.0 }
 0x34d   :  { %v4448_v39 = vpop.f32.mrb[60].mxu0  ;;  %v4450_v37 = vpop.f32.mrb[60].mxu1  ;;  %v2082_v42 = vadd.f32 %v2081_v19, %v2080_v24  ;;  %v2090_v44 = vsel %vm479_vm2, %v1980_v47, 0.0 }
 0x34e   :  { %5402 = vst [vmem:[#allocation52_spill] sm:$0xff] %v4450_v37  ;;  %v1842_v43 = vadd.f32 %v4141_v25, %v4448_v39  ;;  %v1985_v40 = vmul.f32 %v4448_v39, %v4448_v39  ;;  %v4456_v31 = vpop.f32.mrb[61].mxu0  ;;  %v3033_v49 = vpop.f32.mrb[61].mxu1  ;;  %v2089_v51 = vadd.f32 %v2088_v58, %v1979_v56  ;;  %v1836_v28 = vadd.f32 %v1835_v0, %v1834_v61 }
 0x34f   :  { %v1986_v13 = vmul.f32 %v4456_v31, %v4456_v31  ;;  %v1987_v17 = vmul.f32 %v4450_v37, %v4450_v37  ;;  %v1844_v58 = vsel %vm479_vm2, %v4450_v37, 0.0 }
 0x350   :  { %2083 = vadd.xlane.f32.xlu1 %v2082_v42  ;;  %v2091_v25 = vadd.f32 %v2090_v44, %v2089_v51  ;;  %v1843_v24 = vadd.f32 %v1842_v43, %v4456_v31  ;;  %v2097_v19 = vadd.f32 %v4147_v59, %v1985_v40 }
 0x351   :  { %v4467_v49 = vpop.f32.mrb[62].mxu0  ;;  %v4469_v56 = vpop.f32.mrb[62].mxu1  ;;  %v2099_v44 = vsel %vm479_vm2, %v1987_v17, 0.0 }
 0x352   :  { %5403 = vst [vmem:[#allocation53_spill] sm:$0xff] %v4467_v49  ;;  %5404 = vst [vmem:[#allocation54_spill] sm:$0xff] %v4469_v56  ;;  %v1851_v47 = vadd.f32 %v4165_v33, %v4467_v49  ;;  %v1992_v61 = vmul.f32 %v4467_v49, %v4467_v49  ;;  %v3036_v0 = vpop.f32.mrb[63].mxu1  ;;  %2092 = vadd.xlane.f32.xlu0 %v2091_v25  ;;  %v4477_v42 = vpop.f32.mrb[63].mxu0  ;;  %v1845_v43 = vadd.f32 %v1844_v58, %v1843_v24 }
 0x353   :  { %v1994_v59 = vmul.f32 %v4469_v56, %v4469_v56  ;;  %v1993_v40 = vmul.f32 %v4477_v42, %v4477_v42  ;;  %v2098_v51 = vadd.f32 %v2097_v19, %v1986_v13 }
 0x354   :  { %1837 = vadd.xlane.f32.xlu1 %v1836_v28  ;;  %v2106_v33 = vadd.f32 %v4171_v46, %v1992_v61  ;;  %v1852_v38 = vadd.f32 %v1851_v47, %v4477_v42  ;;  %v1853_v46 = vsel %vm479_vm2, %v4469_v56, 0.0 }
 0x355   :  { %v4486_v49 = vpop.f32.mrb[64].mxu0  ;;  %v4488_v25 = vpop.f32.mrb[64].mxu1  ;;  %v2100_v0 = vadd.f32 %v2099_v44, %v2098_v51  ;;  %v2108_v19 = vsel %vm479_vm2, %v1994_v59, 0.0 }
 0x356   :  { %v1860_v24 = vadd.f32 %v4189_v6, %v4486_v49  ;;  %v1999_v58 = vmul.f32 %v4486_v49, %v4486_v49  ;;  %v3039_v37 = vpop.f32.mrb[65].mxu1  ;;  %1846 = vadd.xlane.f32.xlu0 %v1845_v43  ;;  %v4494_v13 = vpop.f32.mrb[65].mxu0  ;;  %v2107_v28 = vadd.f32 %v2106_v33, %v1993_v40  ;;  %v1854_v47 = vadd.f32 %v1853_v46, %v1852_v38 }
 0x357   :  { %v2000_v17 = vmul.f32 %v4494_v13, %v4494_v13  ;;  %v2001_v6 = vmul.f32 %v4488_v25, %v4488_v25  ;;  %v1862_v44 = vsel %vm479_vm2, %v4488_v25, 0.0 }
 0x358   :  { %2101 = vadd.xlane.f32.xlu1 %v2100_v0  ;;  %v2109_v61 = vadd.f32 %v2108_v19, %v2107_v28  ;;  %v1861_v37 = vadd.f32 %v1860_v24, %v4494_v13  ;;  %v2115_v43 = vadd.f32 %v4195_v35, %v1999_v58 }
 0x359   :  { %v4505_v51 = vpop.f32.mrb[66].mxu0  ;;  %v4507_v40 = vpop.f32.mrb[66].mxu1  ;;  %v2117_v46 = vsel %vm479_vm2, %v2001_v6, 0.0 }
 0x35a   :  { %5405 = vst [vmem:[#allocation55_spill] sm:$0xff] %v4505_v51  ;;  %5406 = vst [vmem:[#allocation56_spill] sm:$0xff] %v4507_v40  ;;  %v1869_v59 = vadd.f32 %v4213_v45, %v4505_v51  ;;  %v2006_v38 = vmul.f32 %v4505_v51, %v4505_v51  ;;  %v3042_v33 = vpop.f32.mrb[67].mxu1  ;;  %2110 = vadd.xlane.f32.xlu0 %v2109_v61  ;;  %v4515_v0 = vpop.f32.mrb[67].mxu0  ;;  %v1863_v24 = vadd.f32 %v1862_v44, %v1861_v37 }
 0x35b   :  { %v2008_v35 = vmul.f32 %v4507_v40, %v4507_v40  ;;  %v2007_v58 = vmul.f32 %v4515_v0, %v4515_v0  ;;  %v2116_v28 = vadd.f32 %v2115_v43, %v2000_v17 }
 0x35c   :  { %1855 = vadd.xlane.f32.xlu1 %v1854_v47  ;;  %v2124_v45 = vadd.f32 %v4219_v60, %v2006_v38  ;;  %v1870_v19 = vadd.f32 %v1869_v59, %v4515_v0  ;;  %v1871_v60 = vsel %vm479_vm2, %v4507_v40, 0.0 }
 0x35d   :  { %v4524_v51 = vpop.f32.mrb[68].mxu0  ;;  %v4526_v61 = vpop.f32.mrb[68].mxu1  ;;  %v2118_v33 = vadd.f32 %v2117_v46, %v2116_v28  ;;  %v2126_v43 = vsel %vm479_vm2, %v2008_v35, 0.0 }
 0x35e   :  { %v1878_v37 = vadd.f32 %v4237_v48, %v4524_v51  ;;  %v2013_v44 = vmul.f32 %v4524_v51, %v4524_v51  ;;  %v3045_v56 = vpop.f32.mrb[69].mxu1  ;;  %1864 = vadd.xlane.f32.xlu0 %v1863_v24  ;;  %v4532_v17 = vpop.f32.mrb[69].mxu0  ;;  %v2125_v47 = vadd.f32 %v2124_v45, %v2007_v58  ;;  %v1872_v59 = vadd.f32 %v1871_v60, %v1870_v19 }
 0x35f   :  { %v2014_v6 = vmul.f32 %v4532_v17, %v4532_v17  ;;  %v2015_v48 = vmul.f32 %v4526_v61, %v4526_v61  ;;  %v1880_v46 = vsel %vm479_vm2, %v4526_v61, 0.0 }
 0x360   :  { %2119 = vadd.xlane.f32.xlu1 %v2118_v33  ;;  %v2127_v38 = vadd.f32 %v2126_v43, %v2125_v47  ;;  %v1879_v56 = vadd.f32 %v1878_v37, %v4532_v17  ;;  %v2133_v24 = vadd.f32 %v4243_v1, %v2013_v44 }
 0x361   :  { %v4543_v28 = vpop.f32.mrb[70].mxu0  ;;  %v4545_v58 = vpop.f32.mrb[70].mxu1  ;;  %v2135_v60 = vsel %vm479_vm2, %v2015_v48, 0.0 }
 0x362   :  { %5407 = vst [vmem:[#allocation57_spill] sm:$0xff] %v4543_v28  ;;  %5408 = vst [vmem:[#allocation58_spill] sm:$0xff] %v4545_v58  ;;  %v1887_v35 = vadd.f32 %v4261_v32, %v4543_v28  ;;  %v2020_v45 = vmul.f32 %v4543_v28, %v4543_v28  ;;  %v3048_v19 = vpop.f32.mrb[71].mxu1  ;;  %2128 = vadd.xlane.f32.xlu0 %v2127_v38  ;;  %v4553_v33 = vpop.f32.mrb[71].mxu0  ;;  %v1881_v37 = vadd.f32 %v1880_v46, %v1879_v56 }
 0x363   :  { %v2022_v1 = vmul.f32 %v4545_v58, %v4545_v58  ;;  %v2021_v44 = vmul.f32 %v4553_v33, %v4553_v33  ;;  %v2134_v47 = vadd.f32 %v2133_v24, %v2014_v6 }
 0x364   :  { %1873 = vadd.xlane.f32.xlu1 %v1872_v59  ;;  %v2142_v32 = vadd.f32 %v4267_v54, %v2020_v45  ;;  %v1888_v43 = vadd.f32 %v1887_v35, %v4553_v33  ;;  %v1889_v54 = vsel %vm479_vm2, %v4545_v58, 0.0 }
 0x365   :  { %v4562_v28 = vpop.f32.mrb[72].mxu0  ;;  %v4564_v38 = vpop.f32.mrb[72].mxu1  ;;  %v2136_v19 = vadd.f32 %v2135_v60, %v2134_v47  ;;  %v2144_v24 = vsel %vm479_vm2, %v2022_v1, 0.0 }
 0x366   :  { %5409 = vst [vmem:[#allocation59_spill] sm:$0xff] %v4564_v38  ;;  %v1896_v56 = vadd.f32 %v4285_v55, %v4562_v28  ;;  %v2027_v46 = vmul.f32 %v4562_v28, %v4562_v28  ;;  %v3051_v40 = vpop.f32.mrb[73].mxu1  ;;  %1882 = vadd.xlane.f32.xlu0 %v1881_v37  ;;  %v4570_v6 = vpop.f32.mrb[73].mxu0  ;;  %v2143_v59 = vadd.f32 %v2142_v32, %v2021_v44  ;;  %v1898_v60 = vsel %vm479_vm2, %v4564_v38, 0.0 }
 0x367   :  { %5410 = vst [vmem:[#allocation60_spill] sm:$0xff] %v4570_v6  ;;  %v2028_v48 = vmul.f32 %v4570_v6, %v4570_v6  ;;  %v1890_v35 = vadd.f32 %v1889_v54, %v1888_v43  ;;  %v2029_v55 = vmul.f32 %v4564_v38, %v4564_v38  ;;  %v3273_v54 = vmov 0  }
 0x368   :  { %2137 = vadd.xlane.f32.xlu1 %v2136_v19  ;;  %v2145_v45 = vadd.f32 %v2144_v24, %v2143_v59  ;;  %v1897_v40 = vadd.f32 %v1896_v56, %v4570_v6  ;;  %v2151_v37 = vadd.f32 %v4291_v20, %v2027_v46  ;;  %3235 = vset.pattern.permute.xlu0 %v3273_v54 }
 0x369   :  { %v4581_v47 = vpop.f32.mrb[74].mxu0  ;;  %v4583_v44 = vpop.f32.mrb[74].mxu1  ;;  %3236 = vset.pattern.permute.xlu1 %v3273_v54 }
 0x36a   :  { %5411 = vst [vmem:[#allocation61_spill] sm:$0xff] %v4581_v47  ;;  %5412 = vst [vmem:[#allocation62_spill] sm:$0xff] %v4583_v44  ;;  %v1905_v1 = vadd.f32 %v4309_v9, %v4581_v47  ;;  %v2034_v32 = vmul.f32 %v4581_v47, %v4581_v47  ;;  %v3054_v43 = vpop.f32.mrb[75].mxu1  ;;  %2146 = vadd.xlane.f32.xlu0 %v2145_v45  ;;  %v4591_v19 = vpop.f32.mrb[75].mxu0  ;;  %v1899_v56 = vadd.f32 %v1898_v60, %v1897_v40 }
 0x36b   :  { %5413 = vst [vmem:[#allocation63_spill] sm:$0xff] %v4591_v19  ;;  %v2036_v20 = vmul.f32 %v4583_v44, %v4583_v44  ;;  %v2035_v46 = vmul.f32 %v4591_v19, %v4591_v19  ;;  %v2152_v59 = vadd.f32 %v2151_v37, %v2028_v48  ;;  %v2153_v9 = vsel %vm479_vm2, %v2029_v55, 0.0 }
 0x36c   :  { %1891 = vadd.xlane.f32.xlu1 %v1890_v35  ;;  %v2160_v24 = vadd.f32 %v4315_v29, %v2034_v32  ;;  %v1906_v45 = vadd.f32 %v1905_v1, %v4591_v19  ;;  %v1907_v29 = vsel %vm479_vm2, %v4583_v44, 0.0 }
 0x36d   :  { %v4600_v43 = vpop.f32.mrb[76].mxu0  ;;  %v4602_v40 = vpop.f32.mrb[76].mxu1  ;;  %v2154_v60 = vadd.f32 %v2153_v9, %v2152_v59  ;;  %v2162_v32 = vsel %vm479_vm2, %v2036_v20, 0.0 }
 0x36e   :  { %5414 = vst [vmem:[#allocation64_spill] sm:$0xff] %v4600_v43  ;;  %5415 = vst [vmem:[#allocation65_spill] sm:$0xff] %v4602_v40  ;;  %v1914_v47 = vadd.f32 %v4333_v63, %v4600_v43  ;;  %v2041_v48 = vmul.f32 %v4600_v43, %v4600_v43  ;;  %v3057_v37 = vpop.f32.mrb[77].mxu1  ;;  %1900 = vadd.xlane.f32.xlu0 %v1899_v56  ;;  %v4608_v35 = vpop.f32.mrb[77].mxu0  ;;  %v2161_v55 = vadd.f32 %v2160_v24, %v2035_v46 }
 0x36f   :  { %5416 = vst [vmem:[#allocation66_spill] sm:$0xff] %v4608_v35  ;;  %v2042_v1 = vmul.f32 %v4608_v35, %v4608_v35  ;;  %v1908_v59 = vadd.f32 %v1907_v29, %v1906_v45  ;;  %v2043_v63 = vmul.f32 %v4602_v40, %v4602_v40  ;;  %v1916_v24 = vsel %vm479_vm2, %v4602_v40, 0.0 }
 0x370   :  { %2155 = vadd.xlane.f32.xlu1 %v2154_v60  ;;  %v2163_v54 = vadd.f32 %v2162_v32, %v2161_v55  ;;  %v1915_v9 = vadd.f32 %v1914_v47, %v4608_v35  ;;  %v2169_v56 = vadd.f32 %v4339_v27, %v2041_v48 }
 0x371   :  { %v4619_v37 = vpop.f32.mrb[78].mxu0  ;;  %v4621_v46 = vpop.f32.mrb[78].mxu1  ;;  %v2171_v32 = vsel %vm479_vm2, %v2043_v63, 0.0 }
 0x372   :  { %5417 = vst [vmem:[#allocation67_spill] sm:$0xff] %v4619_v37  ;;  %5418 = vst [vmem:[#allocation68_spill] sm:$0xff] %v4621_v46  ;;  %v1923_v20 = vadd.f32 %v4357_v14, %v4619_v37  ;;  %v2048_v45 = vmul.f32 %v4619_v37, %v4619_v37  ;;  %v3060_v29 = vpop.f32.mrb[79].mxu1  ;;  %2164 = vadd.xlane.f32.xlu0 %v2163_v54  ;;  %v4629_v60 = vpop.f32.mrb[79].mxu0  ;;  %v1917_v47 = vadd.f32 %v1916_v24, %v1915_v9 }
 0x373   :  { %5419 = vst [vmem:[#allocation69_spill] sm:$0xff] %v4629_v60  ;;  %v2049_v27 = vmul.f32 %v4629_v60, %v4629_v60  ;;  %v2170_v48 = vadd.f32 %v2169_v56, %v2042_v1  ;;  %v2050_v55 = vmul.f32 %v4621_v46, %v4621_v46  ;;  %v1925_v9 = vsel %vm479_vm2, %v4621_v46, 0.0 }
 0x374   :  { %1909 = vadd.xlane.f32.xlu1 %v1908_v59  ;;  %v1924_v14 = vadd.f32 %v1923_v20, %v4629_v60  ;;  %v2178_v44 = vadd.f32 %v4363_v10, %v2048_v45 }
 0x375   :  { %v4638_v37 = vpop.f32.mrb[80].mxu0  ;;  %v4640_v54 = vpop.f32.mrb[80].mxu1  ;;  %v2172_v29 = vadd.f32 %v2171_v32, %v2170_v48  ;;  %v2180_v32 = vsel %vm479_vm2, %v2050_v55, 0.0 }
 0x376   :  { %5420 = vst [vmem:[#allocation70_spill] sm:$0xff] %v4638_v37  ;;  %5421 = vst [vmem:[#allocation71_spill] sm:$0xff] %v4640_v54  ;;  %v1932_v1 = vadd.f32 %v4379_v30, %v4638_v37  ;;  %v2055_v59 = vmul.f32 %v4638_v37, %v4638_v37  ;;  %v3063_v56 = vpop.f32.mrb[81].mxu1  ;;  %1918 = vadd.xlane.f32.xlu0 %v1917_v47  ;;  %v4648_v63 = vpop.f32.mrb[81].mxu0  ;;  %v1926_v24 = vadd.f32 %v1925_v9, %v1924_v14 }
 0x377   :  { %5422 = vst [vmem:[#allocation72_spill] sm:$0xff] %v4648_v63  ;;  %v2057_v10 = vmul.f32 %v4640_v54, %v4640_v54  ;;  %v2056_v20 = vmul.f32 %v4648_v63, %v4648_v63  ;;  %v2179_v45 = vadd.f32 %v2178_v44, %v2049_v27  ;;  %v1934_v47 = vsel %vm479_vm2, %v4640_v54, 0.0 }
 0x378   :  { %v1933_v48 = vadd.f32 %v1932_v1, %v4648_v63  ;;  %2173 = vadd.xlane.f32.xlu1 %v2172_v29  ;;  %v2187_v30 = vadd.f32 %v4389_v18, %v2055_v59 }
 0x379   :  { %v2181_v56 = vadd.f32 %v2180_v32, %v2179_v45  ;;  %v2189_v9 = vsel %vm479_vm2, %v2057_v10, 0.0 }
 0x37a   :  { %v1935_v46 = vadd.f32 %v1934_v47, %v1933_v48  ;;  %v2188_v14 = vadd.f32 %v2187_v30, %v2056_v20 }
 0x37c   :  { %1927 = vadd.xlane.f32.xlu1 %v1926_v24  ;;  %1936 = vadd.xlane.f32.xlu0 %v1935_v46  ;;  %v2190_v60 = vadd.f32 %v2189_v9, %v2188_v14 }
 0x380   :  { %2191 = vadd.xlane.f32.xlu1 %v2190_v60  ;;  %2182 = vadd.xlane.f32.xlu0 %v2181_v56 }
 0x3d1   :  { %v1811_v44 = vpop.xlane.xlu0 %1810 }
 0x3d2   :  { %v1938_v27 = vmul.f32 0.0012755102, %v1811_v44 }
 0x3d3   :  { %v2066_v1 = vpop.xlane.xlu1 %2065 }
 0x3d4   :  { %v2208_v29 = vmul.f32 %v1938_v27, %v1938_v27  ;;  %v2193_v18 = vmul.f32 0.0012755102, %v2066_v1 }
 0x3d5   :  { %v1820_v59 = vpop.xlane.xlu0 %1819 }
 0x3d6   :  { %v1939_v55 = vmul.f32 0.0012755102, %v1820_v59  ;;  %v2223_v63 = vsub.f32 %v2193_v18, %v2208_v29 }
 0x3d8   :  { %v2268_v37 = vadd.f32 0.001, %v2223_v63  ;;  %v2209_v48 = vmul.f32 %v1939_v55, %v1939_v55  ;;  %v2238_v63 = vld [vmem:[%s5279_s4] sm:$0xff] }
 0x3d9   :  { %v2075_v54 = vpop.xlane.xlu0 %2074  ;;  %v1829_v45 = vpop.xlane.xlu1 %1828 }
 0x3da   :  { %v2194_v20 = vmul.f32 0.0012755102, %v2075_v54  ;;  %v1940_v30 = vmul.f32 0.0012755102, %v1829_v45  ;;  %3239 = vrsqrt.f32 %v2268_v37 }
 0x3dc   :  { %v2224_v24 = vsub.f32 %v2194_v20, %v2209_v48  ;;  %v2210_v60 = vmul.f32 %v1940_v30, %v1940_v30 }
 0x3dd   :  { %v2084_v46 = vpop.xlane.xlu1 %2083 }
 0x3de   :  { %v2269_v10 = vadd.f32 0.001, %v2224_v24  ;;  %v2195_v32 = vmul.f32 0.0012755102, %v2084_v46 }
 0x3df   :  { %v2093_v47 = vpop.xlane.xlu0 %2092 }
 0x3e0   :  { %3241 = vrsqrt.f32 %v2269_v10  ;;  %v2225_v56 = vsub.f32 %v2195_v32, %v2210_v60  ;;  %v2196_v54 = vmul.f32 0.0012755102, %v2093_v47  ;;  %v2253_v10 = vld [vmem:[%s5279_s4 + $0x78] sm:$0xff] }
 0x3e1   :  { %v1838_v14 = vpop.xlane.xlu1 %1837 }
 0x3e2   :  { %v2270_v9 = vadd.f32 0.001, %v2225_v56  ;;  %v4660_v44 = vmul.f32 0.0012755102, %v1838_v14  ;;  %v2239_v56 = vld [vmem:[%s5279_s4 + $0x8] sm:$0xff] }
 0x3e3   :  { %v1847_v29 = vpop.xlane.xlu0 %1846 }
 0x3e4   :  { %3243 = vrsqrt.f32 %v2270_v9  ;;  %v2211_v37 = vmul.f32 %v4660_v44, %v4660_v44  ;;  %v4667_v1 = vmul.f32 0.0012755102, %v1847_v29  ;;  %v3240_v18 = vpop.eup %3239 }
 0x3e5   :  { %v2102_v59 = vpop.xlane.xlu1 %2101  ;;  %v2298_v24 = vmul.f32 %v3240_v18, %v2238_v63 }
 0x3e6   :  { %v2226_v45 = vsub.f32 %v2196_v54, %v2211_v37  ;;  %v2212_v48 = vmul.f32 %v4667_v1, %v4667_v1  ;;  %v2197_v20 = vmul.f32 0.0012755102, %v2102_v59 }
 0x3e7   :  { %v2111_v46 = vpop.xlane.xlu0 %2110  ;;  %2315 = vperm.xlu0 %3235, %v2298_v24   ;;  %v2493_v47 = vmul.f32 %v2298_v24, %v1938_v27  ;;  %v2240_v27 = vld [vmem:[%s5279_s4 + $0x10] sm:$0xff] }
 0x3e8   :  { %v2271_v60 = vadd.f32 0.001, %v2226_v45  ;;  %v2227_v32 = vsub.f32 %v2197_v20, %v2212_v48  ;;  %v2198_v59 = vmul.f32 0.0012755102, %v2111_v46 }
 0x3e9   :  { %v1856_v14 = vpop.xlane.xlu1 %1855  ;;  %v2508_v63 = vsub.f32 %v2253_v10, %v2493_v47 }
 0x3ea   :  { %v3242_v9 = vpop.eup %3241  ;;  %3245 = vrsqrt.f32 %v2271_v60  ;;  %v2272_v29 = vadd.f32 0.001, %v2227_v32  ;;  %v4677_v54 = vmul.f32 0.0012755102, %v1856_v14 }
 0x3eb   :  { %v1865_v37 = vpop.xlane.xlu0 %1864  ;;  %v2299_v18 = vmul.f32 %v3242_v9, %v2239_v56  ;;  %2525 = vperm.xlu0 %3235, %v2508_v63   ;;  %v2254_v9 = vld [vmem:[%s5279_s4 + $0x80] sm:$0xff] }
 0x3ec   :  { %3247 = vrsqrt.f32 %v2272_v29  ;;  %v2213_v45 = vmul.f32 %v4677_v54, %v4677_v54  ;;  %v4681_v48 = vmul.f32 0.0012755102, %v1865_v37  ;;  %v2255_v29 = vld [vmem:[%s5279_s4 + $0x88] sm:$0xff] }
 0x3ed   :  { %v2120_v20 = vpop.xlane.xlu1 %2119  ;;  %2320 = vperm.xlu1 %3236, %v2299_v18   ;;  %v2494_v56 = vmul.f32 %v2299_v18, %v1939_v55  ;;  %v2241_v18 = vld [vmem:[%s5279_s4 + $0x18] sm:$0xff] }
 0x3ee   :  { %v3244_v24 = vpop.eup %3243  ;;  %v2228_v60 = vsub.f32 %v2198_v59, %v2213_v45  ;;  %v2214_v10 = vmul.f32 %v4681_v48, %v4681_v48  ;;  %v2199_v32 = vmul.f32 0.0012755102, %v2120_v20 }
 0x3ef   :  { %v2129_v47 = vpop.xlane.xlu0 %2128  ;;  %v2300_v46 = vmul.f32 %v3244_v24, %v2240_v27  ;;  %v2509_v35 = vsub.f32 %v2254_v9, %v2494_v56 }
 0x3f0   :  { %v2229_v14 = vsub.f32 %v2199_v32, %v2214_v10  ;;  %v2273_v59 = vadd.f32 0.001, %v2228_v60  ;;  %v2242_v10 = vld [vmem:[%s5279_s4 + $0x20] sm:$0xff]  ;;  %v2200_v9 = vmul.f32 0.0012755102, %v2129_v47 }
 0x3f1   :  { %v1874_v63 = vpop.xlane.xlu1 %1873  ;;  %2325 = vperm.xlu1 %3236, %v2300_v46   ;;  %v2495_v37 = vmul.f32 %v2300_v46, %v1940_v30 }
 0x3f2   :  { %v2274_v45 = vadd.f32 0.001, %v2229_v14  ;;  %v4694_v40 = vmul.f32 0.0012755102, %v1874_v63 }
 0x3f3   :  { %v1883_v20 = vpop.xlane.xlu0 %1882  ;;  %v2510_v27 = vsub.f32 %v2255_v29, %v2495_v37 }
 0x3f4   :  { %v3246_v55 = vpop.eup %3245  ;;  %3249 = vrsqrt.f32 %v2274_v45  ;;  %v4699_v24 = vmul.f32 0.0012755102, %v1883_v20  ;;  %v2215_v30 = vmul.f32 %v4694_v40, %v4694_v40  ;;  %v2257_v45 = vld [vmem:[%s5279_s4 + $0x98] sm:$0xff] }
 0x3f5   :  { %v2138_v60 = vpop.xlane.xlu1 %2137  ;;  %2530 = vperm.xlu1 %3236, %v2509_v35   ;;  %2535 = vperm.xlu0 %3235, %v2510_v27   ;;  %3251 = vrsqrt.f32 %v2273_v59  ;;  %v2301_v14 = vmul.f32 %v3246_v55, %v2241_v18 }
 0x3f6   :  { %v3248_v32 = vpop.eup %3247  ;;  %v2216_v46 = vmul.f32 %v4699_v24, %v4699_v24  ;;  %v2201_v56 = vmul.f32 0.0012755102, %v2138_v60  ;;  %v2230_v20 = vsub.f32 %v2200_v9, %v2215_v30  ;;  %v2256_v30 = vld [vmem:[%s5279_s4 + $0x90] sm:$0xff] }
 0x3f7   :  { %v2147_v29 = vpop.xlane.xlu0 %2146  ;;  %v2302_v63 = vmul.f32 %v3248_v32, %v2242_v10  ;;  %v2496_v19 = vmul.f32 %v2301_v14, %v4660_v44 }
 0x3f8   :  { %v2231_v37 = vsub.f32 %v2201_v56, %v2216_v46  ;;  %v2202_v47 = vmul.f32 0.0012755102, %v2147_v29 }
 0x3f9   :  { %v1892_v43 = vpop.xlane.xlu1 %1891  ;;  %2330 = vperm.xlu1 %3236, %v2301_v14   ;;  %v2497_v35 = vmul.f32 %v2302_v63, %v4667_v1  ;;  %v2275_v1 = vadd.f32 0.001, %v2230_v20  ;;  %v2511_v29 = vsub.f32 %v2256_v30, %v2496_v19 }
 0x3fa   :  { %v2276_v27 = vadd.f32 0.001, %v2231_v37  ;;  %v4712_v59 = vmul.f32 0.0012755102, %v1892_v43  ;;  %v2244_v43 = vld [vmem:[%s5279_s4 + $0x30] sm:$0xff] }
 0x3fb   :  { %v1901_v60 = vpop.xlane.xlu0 %1900  ;;  %v2512_v55 = vsub.f32 %v2257_v45, %v2497_v35  ;;  %v2243_v35 = vld [vmem:[%s5279_s4 + $0x28] sm:$0xff] }
 0x3fc   :  { %3253 = vrsqrt.f32 %v2276_v27  ;;  %v2217_v18 = vmul.f32 %v4712_v59, %v4712_v59  ;;  %v4717_v10 = vmul.f32 0.0012755102, %v1901_v60 }
 0x3fd   :  { %v2156_v32 = vpop.xlane.xlu1 %2155  ;;  %2335 = vperm.xlu1 %3236, %v2302_v63   ;;  %2545 = vperm.xlu0 %3235, %v2512_v55   ;;  %v2259_v63 = vld [vmem:[%s5279_s4 + $0xa8] sm:$0xff]  ;;  %3255 = vrsqrt.f32 %v2275_v1 }
 0x3fe   :  { %v3250_v44 = vpop.eup %3249  ;;  %v2232_v46 = vsub.f32 %v2202_v47, %v2217_v18  ;;  %v2218_v56 = vmul.f32 %v4717_v10, %v4717_v10  ;;  %v2203_v14 = vmul.f32 0.0012755102, %v2156_v32 }
 0x3ff   :  { %v2165_v9 = vpop.xlane.xlu0 %2164  ;;  %v2304_v37 = vmul.f32 %v3250_v44, %v2244_v43  ;;  %v3252_v45 = vpop.eup %3251 }
 0x400   :  { %v2277_v27 = vadd.f32 0.001, %v2232_v46  ;;  %v2233_v60 = vsub.f32 %v2203_v14, %v2218_v56  ;;  %v2303_v18 = vmul.f32 %v3252_v45, %v2243_v35  ;;  %v2204_v32 = vmul.f32 0.0012755102, %v2165_v9  ;;  %v2246_v45 = vld [vmem:[%s5279_s4 + $0x40] sm:$0xff] }
 0x401   :  { %v1910_v20 = vpop.xlane.xlu1 %1909  ;;  %2540 = vperm.xlu1 %3236, %v2511_v29   ;;  %v2499_v55 = vmul.f32 %v2304_v37, %v4681_v48 }
 0x402   :  { %3257 = vrsqrt.f32 %v2277_v27  ;;  %v2278_v47 = vadd.f32 0.001, %v2233_v60  ;;  %v4734_v19 = vmul.f32 0.0012755102, %v1910_v20  ;;  %v2498_v9 = vmul.f32 %v2303_v18, %v4677_v54  ;;  %v2258_v60 = vld [vmem:[%s5279_s4 + $0xa0] sm:$0xff] }
 0x403   :  { %v1919_v30 = vpop.xlane.xlu0 %1918  ;;  %v2514_v43 = vsub.f32 %v2259_v63, %v2499_v55 }
 0x404   :  { %3259 = vrsqrt.f32 %v2278_v47  ;;  %v2219_v44 = vmul.f32 %v4734_v19, %v4734_v19  ;;  %v4738_v46 = vmul.f32 0.0012755102, %v1919_v30  ;;  %v2247_v47 = vld [vmem:[%s5279_s4 + $0x48] sm:$0xff] }
 0x405   :  { %v2174_v56 = vpop.xlane.xlu1 %2173  ;;  %2340 = vperm.xlu1 %3236, %v2303_v18   ;;  %2555 = vperm.xlu0 %3235, %v2514_v43  }
 0x406   :  { %v3254_v1 = vpop.eup %3253  ;;  %v2234_v14 = vsub.f32 %v2204_v32, %v2219_v44  ;;  %v2220_v48 = vmul.f32 %v4738_v46, %v4738_v46  ;;  %v2205_v29 = vmul.f32 0.0012755102, %v2174_v56  ;;  %v2513_v32 = vsub.f32 %v2258_v60, %v2498_v9  ;;  %v2245_v56 = vld [vmem:[%s5279_s4 + $0x38] sm:$0xff] }
 0x407   :  { %v2306_v55 = vmul.f32 %v3254_v1, %v2246_v45  ;;  %v3256_v54 = vpop.eup %3255  ;;  %v2261_v60 = vld [vmem:[%s5279_s4 + $0xb8] sm:$0xff] }
 0x408   :  { %v2279_v35 = vadd.f32 0.001, %v2234_v14  ;;  %v2235_v27 = vsub.f32 %v2205_v29, %v2220_v48 }
 0x409   :  { %v1928_v63 = vpop.xlane.xlu1 %1927  ;;  %2345 = vperm.xlu1 %3236, %v2304_v37   ;;  %v1937_v20 = vpop.xlane.xlu0 %1936  ;;  %v2501_v48 = vmul.f32 %v2306_v55, %v4699_v24 }
 0x40a   :  { %3261 = vrsqrt.f32 %v2279_v35  ;;  %v4752_v30 = vmul.f32 0.0012755102, %v1928_v63  ;;  %v4754_v43 = vmul.f32 0.0012755102, %v1937_v20  ;;  %v2280_v18 = vadd.f32 0.001, %v2235_v27 }
 0x40b   :  { %v2248_v63 = vld [vmem:[%s5279_s4 + $0x50] sm:$0xff]  ;;  %v2305_v20 = vmul.f32 %v3256_v54, %v2245_v56 }
 0x40c   :  { %v3258_v44 = vpop.eup %3257  ;;  %v2221_v45 = vmul.f32 %v4752_v30, %v4752_v30  ;;  %v2222_v35 = vmul.f32 %v4754_v43, %v4754_v43  ;;  %3263 = vrsqrt.f32 %v2280_v18  ;;  %v2260_v54 = vld [vmem:[%s5279_s4 + $0xb0] sm:$0xff] }
 0x40d   :  { %v2307_v37 = vmul.f32 %v3258_v44, %v2247_v47  ;;  %2550 = vperm.xlu1 %3236, %v2513_v32   ;;  %v2192_v1 = vpop.xlane.xlu1 %2191  ;;  %v2183_v14 = vpop.xlane.xlu0 %2182  ;;  %v2516_v32 = vsub.f32 %v2261_v60, %v2501_v48  ;;  %v2500_v38 = vmul.f32 %v2305_v20, %v4694_v40  ;;  %v2263_v48 = vld [vmem:[%s5279_s4 + $0xc8] sm:$0xff] }
 0x40e   :  { %v3260_v29 = vpop.eup %3259  ;;  %v2207_v27 = vmul.f32 0.0012755102, %v2192_v1  ;;  %v2206_v9 = vmul.f32 0.0012755102, %v2183_v14  ;;  %v2249_v1 = vld [vmem:[%s5279_s4 + $0x58] sm:$0xff] }
 0x40f   :  { %2360 = vperm.xlu0 %3235, %v2307_v37   ;;  %v2308_v44 = vmul.f32 %v3260_v29, %v2248_v63  ;;  %v2515_v29 = vsub.f32 %v2260_v54, %v2500_v38  ;;  %v2251_v38 = vld [vmem:[%s5279_s4 + $0x68] sm:$0xff] }
 0x410   :  { %v2237_v24 = vsub.f32 %v2207_v27, %v2222_v35  ;;  %v2236_v47 = vsub.f32 %v2206_v9, %v2221_v45  ;;  %v2250_v35 = vld [vmem:[%s5279_s4 + $0x60] sm:$0xff]  ;;  %v2502_v27 = vmul.f32 %v2307_v37, %v4712_v59 }
 0x411   :  { %2350 = vperm.xlu1 %3236, %v2305_v20   ;;  %v2503_v56 = vmul.f32 %v2308_v44, %v4717_v10  ;;  %v2252_v10 = vld [vmem:[%s5279_s4 + $0x70] sm:$0xff]  ;;  %v2265_v20 = vld [vmem:[%s5279_s4 + $0xd8] sm:$0xff] }
 0x412   :  { %v2282_v14 = vadd.f32 0.001, %v2237_v24  ;;  %v2281_v58 = vadd.f32 0.001, %v2236_v47 }
 0x413   :  { %2565 = vperm.xlu0 %3235, %v2516_v32   ;;  %v2518_v40 = vsub.f32 %v2263_v48, %v2503_v56  ;;  %v2264_v32 = vld [vmem:[%s5279_s4 + $0xd0] sm:$0xff] }
 0x414   :  { %v3262_v6 = vpop.eup %3261  ;;  %3265 = vrsqrt.f32 %v2282_v14 }
 0x415   :  { %v2309_v18 = vmul.f32 %v3262_v6, %v2249_v1  ;;  %3267 = vrsqrt.f32 %v2281_v58  ;;  %2355 = vperm.xlu1 %3236, %v2306_v55   ;;  %v2262_v58 = vld [vmem:[%s5279_s4 + $0xc0] sm:$0xff] }
 0x416   :  { %v3264_v45 = vpop.eup %3263  ;;  %v2517_v60 = vsub.f32 %v2262_v58, %v2502_v27 }
 0x417   :  { %2370 = vperm.xlu0 %3235, %v2309_v18   ;;  %v2310_v6 = vmul.f32 %v3264_v45, %v2250_v35  ;;  %v2504_v24 = vmul.f32 %v2309_v18, %v4734_v19  ;;  %v2266_v19 = vld [vmem:[%s5279_s4 + $0xe0] sm:$0xff] }
 0x419   :  { %2560 = vperm.xlu1 %3236, %v2515_v29   ;;  %v2505_v59 = vmul.f32 %v2310_v6, %v4738_v46  ;;  %v2267_v46 = vld [vmem:[%s5279_s4 + $0xe8] sm:$0xff]  ;;  %v2519_v1 = vsub.f32 %v2264_v32, %v2504_v24 }
 0x41b   :  { %2575 = vperm.xlu0 %3235, %v2518_v40   ;;  %v2520_v47 = vsub.f32 %v2265_v20, %v2505_v59 }
 0x41d   :  { %2365 = vperm.xlu1 %3236, %v2308_v44  }
 0x41e   :  { %v3266_v55 = vpop.eup %3265 }
 0x41f   :  { %v3268_v9 = vpop.eup %3267  ;;  %v2312_v37 = vmul.f32 %v3266_v55, %v2252_v10 }
 0x420   :  { %v2311_v63 = vmul.f32 %v3268_v9, %v2251_v38 }
 0x421   :  { %2570 = vperm.xlu1 %3236, %v2517_v60   ;;  %v2507_v44 = vmul.f32 %v2312_v37, %v4754_v43 }
 0x422   :  { %2380 = vperm.xlu0 %3235, %v2311_v63   ;;  %v2506_v54 = vmul.f32 %v2311_v63, %v4752_v30 }
 0x423   :  { %v2522_v14 = vsub.f32 %v2267_v46, %v2507_v44 }
 0x424   :  { %v2521_v18 = vsub.f32 %v2266_v19, %v2506_v54  ;;  %v5423_v19 = vld [vmem:[#allocation2_spill] sm:$0xff] }
 0x425   :  { %2375 = vperm.xlu1 %3236, %v2310_v6  }
 0x426   :  { %2585 = vperm.xlu0 %3235, %v2520_v47  }
 0x429   :  { %2580 = vperm.xlu1 %3236, %v2519_v1  }
 0x42a   :  { %2595 = vperm.xlu0 %3235, %v2522_v14  }
 0x42d   :  { %2385 = vperm.xlu1 %3236, %v2312_v37  }
 0x431   :  { %2590 = vperm.xlu1 %3236, %v2521_v18  }
 0x466   :  { %v2316_v43 = vpop.permute.xlu0 %2315 }
 0x467   :  { %v2388_v56 = vmul.f32 %v2316_v43, %v4015_v2  ;;  %v2389_v48 = vmul.f32 %v2316_v43, %v4021_v7  ;;  %v2390_v29 = vmul.f32 %v2316_v43, %v4017_v5  ;;  %v2391_v45 = vmul.f32 %v2316_v43, %v4023_v8 }
 0x468   :  { %v2392_v40 = vmul.f32 %v2316_v43, %v4368_v57  ;;  %v2393_v30 = vmul.f32 %v2316_v43, %v4376_v62  ;;  %v2394_v35 = vmul.f32 %v2316_v43, %v4370_v52  ;;  %v5424_v43 = vld [vmem:[#allocation4_spill] sm:$0xff] }
 0x46a   :  { %v2526_v27 = vpop.permute.xlu0 %2525 }
 0x46b   :  { %v2598_v58 = vadd.f32 %v2526_v27, %v2388_v56  ;;  %v2599_v6 = vadd.f32 %v2526_v27, %v2389_v48  ;;  %v2600_v38 = vadd.f32 %v2526_v27, %v2390_v29  ;;  %v2601_v10 = vadd.f32 %v2526_v27, %v2391_v45  ;;  %v5425_v48 = vld [vmem:[#allocation3_spill] sm:$0xff]  ;;  %v5426_v45 = vld [vmem:[#allocation5_spill] sm:$0xff] }
 0x46c   :  { %v2321_v55 = vpop.permute.xlu1 %2320  ;;  %v2602_v9 = vadd.f32 %v2526_v27, %v2392_v40  ;;  %v2603_v2 = vadd.f32 %v2526_v27, %v2393_v30  ;;  %v2604_v60 = vadd.f32 %v2526_v27, %v2394_v35  ;;  %v5427_v30 = vld [vmem:[#allocation50_spill] sm:$0xff] }
 0x46d   :  { %2703 = vst [vmem:[%s5280_s5] sm:$0xff] %v2598_v58  ;;  %2704 = vst [vmem:[%s5280_s5 + $0x8] sm:$0xff] %v2599_v6  ;;  %v2395_v7 = vmul.f32 %v2321_v55, %v4032_v15  ;;  %v2396_v8 = vmul.f32 %v2321_v55, %v4040_v22  ;;  %v2397_v52 = vmul.f32 %v2321_v55, %v4034_v16  ;;  %v5428_v58 = vld [vmem:[#allocation6_spill] sm:$0xff] }
 0x46e   :  { %2705 = vst [vmem:[%s5280_s5 + $0x10] sm:$0xff] %v2600_v38  ;;  %2706 = vst [vmem:[%s5280_s5 + $0x18] sm:$0xff] %v2601_v10  ;;  %v2398_v57 = vmul.f32 %v2321_v55, %v4042_v23  ;;  %v2399_v62 = vmul.f32 %v2321_v55, %v4391_v36  ;;  %v2400_v63 = vmul.f32 %v2321_v55, %v4401_v34  ;;  %v5429_v38 = vld [vmem:[#allocation8_spill] sm:$0xff] }
 0x46f   :  { %2707 = vst [vmem:[%s5280_s5 + $0x20] sm:$0xff] %v2602_v9  ;;  %2708 = vst [vmem:[%s5280_s5 + $0x28] sm:$0xff] %v2603_v2  ;;  %v2401_v59 = vmul.f32 %v2321_v55, %v4393_v53  ;;  %v5430_v55 = vld [vmem:[#allocation7_spill] sm:$0xff]  ;;  %v5431_v2 = vld [vmem:[#allocation9_spill] sm:$0xff] }
 0x470   :  { %2709 = vst.msk [vmem:[%s5280_s5 + $0x30] sm:$0xff] %vm479_vm2, %v2604_v60  ;;  %v2326_v5 = vpop.permute.xlu1 %2325 }
 0x471   :  { %v2402_v37 = vmul.f32 %v2326_v5, %v4056_v4  ;;  %v2403_v20 = vmul.f32 %v2326_v5, %v4064_v26  ;;  %v2404_v24 = vmul.f32 %v2326_v5, %v4058_v12  ;;  %v2405_v15 = vmul.f32 %v2326_v5, %v4066_v11 }
 0x472   :  { %v2406_v22 = vmul.f32 %v2326_v5, %v4410_v41  ;;  %v2407_v16 = vmul.f32 %v2326_v5, %v4420_v50  ;;  %v2408_v23 = vmul.f32 %v2326_v5, %v4412_v21 }
 0x474   :  { %v2531_v47 = vpop.permute.xlu1 %2530  ;;  %v2536_v36 = vpop.permute.xlu0 %2535 }
 0x475   :  { %v2605_v32 = vadd.f32 %v2531_v47, %v2395_v7  ;;  %v2606_v34 = vadd.f32 %v2531_v47, %v2396_v8  ;;  %v2607_v44 = vadd.f32 %v2531_v47, %v2397_v52  ;;  %v2608_v53 = vadd.f32 %v2531_v47, %v2398_v57  ;;  %v5432_v52 = vld [vmem:[#allocation52_spill] sm:$0xff] }
 0x476   :  { %v2609_v46 = vadd.f32 %v2531_v47, %v2399_v62  ;;  %v2610_v4 = vadd.f32 %v2531_v47, %v2400_v63  ;;  %v2611_v1 = vadd.f32 %v2531_v47, %v2401_v59  ;;  %v2612_v26 = vadd.f32 %v2536_v36, %v2402_v37 }
 0x477   :  { %2710 = vst [vmem:[%s5280_s5 + $0x38] sm:$0xff] %v2605_v32  ;;  %2711 = vst [vmem:[%s5280_s5 + $0x40] sm:$0xff] %v2606_v34  ;;  %v2613_v12 = vadd.f32 %v2536_v36, %v2403_v20  ;;  %v2614_v11 = vadd.f32 %v2536_v36, %v2404_v24  ;;  %v2615_v21 = vadd.f32 %v2536_v36, %v2405_v15  ;;  %v5433_v24 = vld [vmem:[#allocation51_spill] sm:$0xff] }
 0x478   :  { %2712 = vst [vmem:[%s5280_s5 + $0x48] sm:$0xff] %v2607_v44  ;;  %2713 = vst [vmem:[%s5280_s5 + $0x50] sm:$0xff] %v2608_v53  ;;  %v2616_v41 = vadd.f32 %v2536_v36, %v2406_v22  ;;  %v2617_v50 = vadd.f32 %v2536_v36, %v2407_v16  ;;  %v2618_v14 = vadd.f32 %v2536_v36, %v2408_v23  ;;  %v2331_v54 = vpop.permute.xlu1 %2330 }
 0x479   :  { %2714 = vst [vmem:[%s5280_s5 + $0x58] sm:$0xff] %v2609_v46  ;;  %2715 = vst [vmem:[%s5280_s5 + $0x60] sm:$0xff] %v2610_v4  ;;  %v2409_v18 = vmul.f32 %v2331_v54, %v5423_v19  ;;  %v2410_v56 = vmul.f32 %v2331_v54, %v5424_v43  ;;  %v2411_v29 = vmul.f32 %v2331_v54, %v5425_v48  ;;  %v5434_v46 = vld [vmem:[#allocation10_spill] sm:$0xff]  ;;  %v5440_v43 = vld [vmem:[#allocation16_spill] sm:$0xff] }
 0x47a   :  { %2716 = vst.msk [vmem:[%s5280_s5 + $0x68] sm:$0xff] %vm479_vm2, %v2611_v1  ;;  %2717 = vst [vmem:[%s5280_s5 + $0x70] sm:$0xff] %v2612_v26  ;;  %v2412_v40 = vmul.f32 %v2331_v54, %v5426_v45  ;;  %v2413_v35 = vmul.f32 %v2331_v54, %v5427_v30  ;;  %v2414_v5 = vmul.f32 %v2331_v54, %v4439_v3  ;;  %v5435_v1 = vld [vmem:[#allocation12_spill] sm:$0xff]  ;;  %v5439_v19 = vld [vmem:[#allocation14_spill] sm:$0xff] }
 0x47b   :  { %2718 = vst [vmem:[%s5280_s5 + $0x78] sm:$0xff] %v2613_v12  ;;  %2719 = vst [vmem:[%s5280_s5 + $0x80] sm:$0xff] %v2614_v11  ;;  %v2415_v15 = vmul.f32 %v2331_v54, %v5433_v24  ;;  %v5436_v12 = vld [vmem:[#allocation11_spill] sm:$0xff]  ;;  %v5442_v45 = vld [vmem:[#allocation17_spill] sm:$0xff] }
 0x47c   :  { %2720 = vst [vmem:[%s5280_s5 + $0x88] sm:$0xff] %v2615_v21  ;;  %2721 = vst [vmem:[%s5280_s5 + $0x90] sm:$0xff] %v2616_v41  ;;  %v2336_v27 = vpop.permute.xlu1 %2335  ;;  %v2546_v62 = vpop.permute.xlu0 %2545  ;;  %v5437_v21 = vld [vmem:[#allocation13_spill] sm:$0xff]  ;;  %v5441_v48 = vld [vmem:[#allocation15_spill] sm:$0xff] }
 0x47d   :  { %2722 = vst [vmem:[%s5280_s5 + $0x98] sm:$0xff] %v2617_v50  ;;  %2723 = vst.msk [vmem:[%s5280_s5 + $0xa0] sm:$0xff] %vm479_vm2, %v2618_v14  ;;  %v2416_v6 = vmul.f32 %v2336_v27, %v5428_v58  ;;  %v2417_v10 = vmul.f32 %v2336_v27, %v5429_v38  ;;  %v2418_v9 = vmul.f32 %v2336_v27, %v5430_v55  ;;  %v5438_v50 = vld [vmem:[#allocation53_spill] sm:$0xff]  ;;  %v5444_v24 = vld [vmem:[#allocation26_spill] sm:$0xff] }
 0x47e   :  { %v2419_v60 = vmul.f32 %v2336_v27, %v5431_v2  ;;  %v2420_v7 = vmul.f32 %v2336_v27, %v4448_v39  ;;  %v2421_v8 = vmul.f32 %v2336_v27, %v4456_v31  ;;  %v2422_v57 = vmul.f32 %v2336_v27, %v5432_v52  ;;  %v5443_v2 = vld [vmem:[#allocation54_spill] sm:$0xff] }
 0x47f   :  { %v2626_v63 = vadd.f32 %v2546_v62, %v2416_v6  ;;  %v2627_v59 = vadd.f32 %v2546_v62, %v2417_v10  ;;  %v2628_v37 = vadd.f32 %v2546_v62, %v2418_v9 }
 0x480   :  { %v2629_v20 = vadd.f32 %v2546_v62, %v2419_v60  ;;  %v2630_v22 = vadd.f32 %v2546_v62, %v2420_v7  ;;  %v2631_v16 = vadd.f32 %v2546_v62, %v2421_v8  ;;  %v2632_v23 = vadd.f32 %v2546_v62, %v2422_v57  ;;  %v2541_v47 = vpop.permute.xlu1 %2540 }
 0x481   :  { %2731 = vst [vmem:[%s5280_s5 + $0xe0] sm:$0xff] %v2626_v63  ;;  %2732 = vst [vmem:[%s5280_s5 + $0xe8] sm:$0xff] %v2627_v59  ;;  %v2619_v39 = vadd.f32 %v2541_v47, %v2409_v18  ;;  %v2620_v3 = vadd.f32 %v2541_v47, %v2410_v56  ;;  %v2621_v31 = vadd.f32 %v2541_v47, %v2411_v29 }
 0x482   :  { %2733 = vst [vmem:[%s5280_s5 + $0xf0] sm:$0xff] %v2628_v37  ;;  %2734 = vst [vmem:[%s5280_s5 + $0xf8] sm:$0xff] %v2629_v20  ;;  %v2622_v36 = vadd.f32 %v2541_v47, %v2412_v40  ;;  %v2623_v32 = vadd.f32 %v2541_v47, %v2413_v35  ;;  %v2624_v34 = vadd.f32 %v2541_v47, %v2414_v5 }
 0x483   :  { %2735 = vst [vmem:[%s5280_s5 + $0x100] sm:$0xff] %v2630_v22  ;;  %2736 = vst [vmem:[%s5280_s5 + $0x108] sm:$0xff] %v2631_v16  ;;  %v2625_v44 = vadd.f32 %v2541_v47, %v2415_v15  ;;  %v5445_v16 = vld [vmem:[#allocation22_spill] sm:$0xff]  ;;  %v5446_v47 = vld [vmem:[#allocation24_spill] sm:$0xff] }
 0x484   :  { %2737 = vst.msk [vmem:[%s5280_s5 + $0x110] sm:$0xff] %vm479_vm2, %v2632_v23  ;;  %2724 = vst [vmem:[%s5280_s5 + $0xa8] sm:$0xff] %v2619_v39  ;;  %v2341_v53 = vpop.permute.xlu1 %2340  ;;  %v2556_v35 = vpop.permute.xlu0 %2555 }
 0x485   :  { %2725 = vst [vmem:[%s5280_s5 + $0xb0] sm:$0xff] %v2620_v3  ;;  %2726 = vst [vmem:[%s5280_s5 + $0xb8] sm:$0xff] %v2621_v31  ;;  %v2423_v4 = vmul.f32 %v2341_v53, %v5434_v46  ;;  %v2424_v26 = vmul.f32 %v2341_v53, %v5435_v1  ;;  %v2425_v11 = vmul.f32 %v2341_v53, %v5436_v12  ;;  %v5447_v3 = vld [vmem:[#allocation23_spill] sm:$0xff] }
 0x486   :  { %2727 = vst [vmem:[%s5280_s5 + $0xc0] sm:$0xff] %v2622_v36  ;;  %2728 = vst [vmem:[%s5280_s5 + $0xc8] sm:$0xff] %v2623_v32  ;;  %v2426_v41 = vmul.f32 %v2341_v53, %v5437_v21  ;;  %v2427_v14 = vmul.f32 %v2341_v53, %v5438_v50  ;;  %v2428_v30 = vmul.f32 %v2341_v53, %v4477_v42  ;;  %v5448_v36 = vld [vmem:[#allocation25_spill] sm:$0xff] }
 0x487   :  { %2729 = vst [vmem:[%s5280_s5 + $0xd0] sm:$0xff] %v2624_v34  ;;  %2730 = vst.msk [vmem:[%s5280_s5 + $0xd8] sm:$0xff] %vm479_vm2, %v2625_v44  ;;  %v2429_v60 = vmul.f32 %v2341_v53, %v5443_v2  ;;  %v5449_v34 = vld [vmem:[#allocation18_spill] sm:$0xff]  ;;  %v5457_v2 = vld [vmem:[#allocation29_spill] sm:$0xff] }
 0x488   :  { %v2346_v54 = vpop.permute.xlu1 %2345 }
 0x489   :  { %v2430_v18 = vmul.f32 %v2346_v54, %v5439_v19  ;;  %v2431_v56 = vmul.f32 %v2346_v54, %v5440_v43  ;;  %v2432_v29 = vmul.f32 %v2346_v54, %v5441_v48  ;;  %v2433_v40 = vmul.f32 %v2346_v54, %v5442_v45  ;;  %v5451_v43 = vld [vmem:[#allocation19_spill] sm:$0xff]  ;;  %v5452_v48 = vld [vmem:[#allocation21_spill] sm:$0xff]  ;;  %v5454_v45 = vld [vmem:[#allocation28_spill] sm:$0xff] }
 0x48a   :  { %v2434_v27 = vmul.f32 %v2346_v54, %v4486_v49  ;;  %v2435_v58 = vmul.f32 %v2346_v54, %v4494_v13  ;;  %v2436_v6 = vmul.f32 %v2346_v54, %v4488_v25 }
 0x48b   :  { %v2640_v38 = vadd.f32 %v2556_v35, %v2430_v18  ;;  %v2641_v10 = vadd.f32 %v2556_v35, %v2431_v56  ;;  %v2642_v55 = vadd.f32 %v2556_v35, %v2432_v29  ;;  %v2643_v9 = vadd.f32 %v2556_v35, %v2433_v40  ;;  %v5453_v29 = vld [vmem:[#allocation55_spill] sm:$0xff] }
 0x48c   :  { %v2644_v5 = vadd.f32 %v2556_v35, %v2434_v27  ;;  %v2645_v7 = vadd.f32 %v2556_v35, %v2435_v58  ;;  %v2646_v8 = vadd.f32 %v2556_v35, %v2436_v6  ;;  %v2551_v52 = vpop.permute.xlu1 %2550 }
 0x48d   :  { %2745 = vst [vmem:[%s5280_s5 + $0x150] sm:$0xff] %v2640_v38  ;;  %2746 = vst [vmem:[%s5280_s5 + $0x158] sm:$0xff] %v2641_v10  ;;  %v2633_v49 = vadd.f32 %v2551_v52, %v2423_v4  ;;  %v2634_v42 = vadd.f32 %v2551_v52, %v2424_v26  ;;  %v2635_v25 = vadd.f32 %v2551_v52, %v2425_v11 }
 0x48e   :  { %2747 = vst [vmem:[%s5280_s5 + $0x160] sm:$0xff] %v2642_v55  ;;  %2748 = vst [vmem:[%s5280_s5 + $0x168] sm:$0xff] %v2643_v9  ;;  %v2636_v13 = vadd.f32 %v2551_v52, %v2426_v41  ;;  %v2637_v57 = vadd.f32 %v2551_v52, %v2427_v14  ;;  %v2638_v62 = vadd.f32 %v2551_v52, %v2428_v30  ;;  %v4991_v59 = vpop.permute.xlu0 %2360  ;;  %v5450_v41 = vld [vmem:[#allocation20_spill] sm:$0xff]  ;;  %v5456_v55 = vld [vmem:[#allocation27_spill] sm:$0xff] }
 0x48f   :  { %2749 = vst [vmem:[%s5280_s5 + $0x170] sm:$0xff] %v2644_v5  ;;  %2750 = vst [vmem:[%s5280_s5 + $0x178] sm:$0xff] %v2645_v7  ;;  %v2639_v63 = vadd.f32 %v2551_v52, %v2429_v60  ;;  %v5017_v15 = vmul.f32 %v4991_v59, %v5444_v24  ;;  %v2452_v40 = vmul.f32 %v4991_v59, %v5454_v45  ;;  %v5458_v5 = vld [vmem:[#allocation57_spill] sm:$0xff] }
 0x490   :  { %2751 = vst.msk [vmem:[%s5280_s5 + $0x180] sm:$0xff] %vm479_vm2, %v2646_v8  ;;  %2738 = vst [vmem:[%s5280_s5 + $0x118] sm:$0xff] %v2633_v49  ;;  %v2351_v37 = vpop.permute.xlu1 %2350  ;;  %v2453_v9 = vmul.f32 %v4991_v59, %v5456_v55  ;;  %v2454_v60 = vmul.f32 %v4991_v59, %v5457_v2  ;;  %v2455_v7 = vmul.f32 %v4991_v59, %v5458_v5 }
 0x491   :  { %2739 = vst [vmem:[%s5280_s5 + $0x120] sm:$0xff] %v2634_v42  ;;  %2740 = vst [vmem:[%s5280_s5 + $0x128] sm:$0xff] %v2635_v25  ;;  %v2437_v44 = vmul.f32 %v2351_v37, %v5449_v34  ;;  %v2438_v50 = vmul.f32 %v2351_v37, %v5450_v41  ;;  %v2439_v56 = vmul.f32 %v2351_v37, %v5451_v43  ;;  %v5459_v42 = vld [vmem:[#allocation30_spill] sm:$0xff] }
 0x492   :  { %2741 = vst [vmem:[%s5280_s5 + $0x130] sm:$0xff] %v2636_v13  ;;  %2742 = vst [vmem:[%s5280_s5 + $0x138] sm:$0xff] %v2637_v57  ;;  %v2566_v20 = vpop.permute.xlu0 %2565  ;;  %v5460_v13 = vld [vmem:[#allocation32_spill] sm:$0xff]  ;;  %v2456_v24 = vmul.f32 %v4991_v59, %v4553_v33  ;;  %v5465_v34 = vld [vmem:[#allocation58_spill] sm:$0xff] }
 0x493   :  { %2743 = vst [vmem:[%s5280_s5 + $0x140] sm:$0xff] %v2638_v62  ;;  %2744 = vst.msk [vmem:[%s5280_s5 + $0x148] sm:$0xff] %vm479_vm2, %v2639_v63  ;;  %v5461_v62 = vld [vmem:[#allocation31_spill] sm:$0xff] }
 0x494   :  { %v2356_v22 = vpop.permute.xlu1 %2355 }
 0x495   :  { %v2444_v23 = vmul.f32 %v2356_v22, %v5445_v16  ;;  %v2445_v39 = vmul.f32 %v2356_v22, %v5446_v47  ;;  %v2446_v31 = vmul.f32 %v2356_v22, %v5447_v3  ;;  %v2447_v32 = vmul.f32 %v2356_v22, %v5448_v36  ;;  %v5463_v16 = vld [vmem:[#allocation60_spill] sm:$0xff]  ;;  %v5464_v47 = vld [vmem:[#allocation59_spill] sm:$0xff] }
 0x496   :  { %v2448_v53 = vmul.f32 %v2356_v22, %v4524_v51  ;;  %v2449_v46 = vmul.f32 %v2356_v22, %v4532_v17  ;;  %v2450_v4 = vmul.f32 %v2356_v22, %v4526_v61  ;;  %v5027_v21 = vpop.permute.xlu0 %2370  ;;  %v2440_v51 = vmul.f32 %v2351_v37, %v5452_v48 }
 0x497   :  { %v2654_v1 = vadd.f32 %v2566_v20, %v2444_v23  ;;  %v2655_v26 = vadd.f32 %v2566_v20, %v2445_v39  ;;  %v2656_v12 = vadd.f32 %v2566_v20, %v2446_v31  ;;  %v2657_v11 = vadd.f32 %v2566_v20, %v2447_v32 }
 0x498   :  { %v2658_v14 = vadd.f32 %v2566_v20, %v2448_v53  ;;  %v2659_v54 = vadd.f32 %v2566_v20, %v2449_v46  ;;  %v2660_v19 = vadd.f32 %v2566_v20, %v2450_v4  ;;  %v2561_v18 = vpop.permute.xlu1 %2560  ;;  %v2441_v17 = vmul.f32 %v2351_v37, %v5453_v29 }
 0x499   :  { %v2442_v61 = vmul.f32 %v2351_v37, %v4515_v0  ;;  %2759 = vst [vmem:[%s5280_s5 + $0x1c0] sm:$0xff] %v2654_v1  ;;  %2760 = vst [vmem:[%s5280_s5 + $0x1c8] sm:$0xff] %v2655_v26  ;;  %v5455_v0 = vld [vmem:[#allocation56_spill] sm:$0xff]  ;;  %v2647_v35 = vadd.f32 %v2561_v18, %v2437_v44  ;;  %v2648_v27 = vadd.f32 %v2561_v18, %v2438_v50  ;;  %v5466_v50 = vld [vmem:[#allocation34_spill] sm:$0xff] }
 0x49a   :  { %2761 = vst [vmem:[%s5280_s5 + $0x1d0] sm:$0xff] %v2656_v12  ;;  %2762 = vst [vmem:[%s5280_s5 + $0x1d8] sm:$0xff] %v2657_v11  ;;  %v2443_v30 = vmul.f32 %v2351_v37, %v5455_v0  ;;  %v2649_v58 = vadd.f32 %v2561_v18, %v2439_v56  ;;  %v2650_v6 = vadd.f32 %v2561_v18, %v2440_v51  ;;  %v2576_v49 = vpop.permute.xlu0 %2575  ;;  %v5462_v37 = vld [vmem:[#allocation33_spill] sm:$0xff] }
 0x49b   :  { %2763 = vst [vmem:[%s5280_s5 + $0x1e0] sm:$0xff] %v2658_v14  ;;  %2764 = vst [vmem:[%s5280_s5 + $0x1e8] sm:$0xff] %v2659_v54  ;;  %v2651_v38 = vadd.f32 %v2561_v18, %v2441_v17  ;;  %v2652_v10 = vadd.f32 %v2561_v18, %v2442_v61  ;;  %v2457_v44 = vmul.f32 %v4991_v59, %v5465_v34  ;;  %v5467_v54 = vld [vmem:[#allocation36_spill] sm:$0xff]  ;;  %v5469_v56 = vld [vmem:[#allocation37_spill] sm:$0xff] }
 0x49c   :  { %2765 = vst.msk [vmem:[%s5280_s5 + $0x1f0] sm:$0xff] %vm479_vm2, %v2660_v19  ;;  %v2653_v8 = vadd.f32 %v2561_v18, %v2443_v30  ;;  %2752 = vst [vmem:[%s5280_s5 + $0x188] sm:$0xff] %v2647_v35  ;;  %v2366_v52 = vpop.permute.xlu1 %2365  ;;  %v2465_v14 = vmul.f32 %v5027_v21, %v5466_v50  ;;  %v2466_v19 = vmul.f32 %v5027_v21, %v5467_v54  ;;  %v5468_v18 = vld [vmem:[#allocation35_spill] sm:$0xff]  ;;  %v5470_v51 = vld [vmem:[#allocation61_spill] sm:$0xff] }
 0x49d   :  { %2753 = vst [vmem:[%s5280_s5 + $0x190] sm:$0xff] %v2648_v27  ;;  %2754 = vst [vmem:[%s5280_s5 + $0x198] sm:$0xff] %v2649_v58  ;;  %v2458_v25 = vmul.f32 %v2366_v52, %v5459_v42  ;;  %v2459_v57 = vmul.f32 %v2366_v52, %v5460_v13  ;;  %v2460_v63 = vmul.f32 %v2366_v52, %v5461_v62  ;;  %v5471_v61 = vld [vmem:[#allocation38_spill] sm:$0xff]  ;;  %v5473_v30 = vld [vmem:[#allocation39_spill] sm:$0xff] }
 0x49e   :  { %2755 = vst [vmem:[%s5280_s5 + $0x1a0] sm:$0xff] %v2650_v6  ;;  %2756 = vst [vmem:[%s5280_s5 + $0x1a8] sm:$0xff] %v2651_v38  ;;  %v2461_v20 = vmul.f32 %v2366_v52, %v5462_v37  ;;  %v2462_v22 = vmul.f32 %v2366_v52, %v4562_v28  ;;  %v2463_v23 = vmul.f32 %v2366_v52, %v5463_v16  ;;  %v5474_v27 = vld [vmem:[#allocation41_spill] sm:$0xff]  ;;  %v5475_v6 = vld [vmem:[#allocation63_spill] sm:$0xff] }
 0x49f   :  { %2757 = vst [vmem:[%s5280_s5 + $0x1b0] sm:$0xff] %v2652_v10  ;;  %2758 = vst.msk [vmem:[%s5280_s5 + $0x1b8] sm:$0xff] %vm479_vm2, %v2653_v8  ;;  %v2464_v39 = vmul.f32 %v2366_v52, %v5464_v47  ;;  %v2668_v3 = vadd.f32 %v2576_v49, %v2458_v25  ;;  %v2669_v31 = vadd.f32 %v2576_v49, %v2459_v57  ;;  %v5476_v10 = vld [vmem:[#allocation64_spill] sm:$0xff]  ;;  %v5479_v25 = vld [vmem:[#allocation62_spill] sm:$0xff] }
 0x4a0   :  { %v2670_v36 = vadd.f32 %v2576_v49, %v2460_v63  ;;  %v2671_v32 = vadd.f32 %v2576_v49, %v2461_v20  ;;  %v2672_v53 = vadd.f32 %v2576_v49, %v2462_v22  ;;  %v2673_v33 = vadd.f32 %v2576_v49, %v2463_v23  ;;  %v2571_v4 = vpop.permute.xlu1 %2570  ;;  %v5482_v34 = vld [vmem:[#allocation43_spill] sm:$0xff]  ;;  %v5489_v54 = vld [vmem:[#allocation70_spill] sm:$0xff] }
 0x4a1   :  { %v2674_v46 = vadd.f32 %v2576_v49, %v2464_v39  ;;  %2773 = vst [vmem:[%s5280_s5 + $0x230] sm:$0xff] %v2668_v3  ;;  %2774 = vst [vmem:[%s5280_s5 + $0x238] sm:$0xff] %v2669_v31  ;;  %v2661_v28 = vadd.f32 %v2571_v4, %v5017_v15  ;;  %v2662_v59 = vadd.f32 %v2571_v4, %v2452_v40  ;;  %v5111_v12 = vpop.permute.xlu0 %2380  ;;  %v5472_v40 = vld [vmem:[#allocation40_spill] sm:$0xff]  ;;  %v5480_v39 = vld [vmem:[#allocation42_spill] sm:$0xff] }
 0x4a2   :  { %2775 = vst [vmem:[%s5280_s5 + $0x240] sm:$0xff] %v2670_v36  ;;  %2776 = vst [vmem:[%s5280_s5 + $0x248] sm:$0xff] %v2671_v32  ;;  %v2663_v1 = vadd.f32 %v2571_v4, %v2453_v9  ;;  %v2664_v26 = vadd.f32 %v2571_v4, %v2454_v60  ;;  %v2665_v11 = vadd.f32 %v2571_v4, %v2455_v7  ;;  %v5477_v9 = vld [vmem:[#allocation66_spill] sm:$0xff]  ;;  %v5478_v60 = vld [vmem:[#allocation65_spill] sm:$0xff] }
 0x4a3   :  { %2777 = vst [vmem:[%s5280_s5 + $0x250] sm:$0xff] %v2672_v53  ;;  %2778 = vst [vmem:[%s5280_s5 + $0x258] sm:$0xff] %v2673_v33  ;;  %v2666_v15 = vadd.f32 %v2571_v4, %v2456_v24  ;;  %v2667_v41 = vadd.f32 %v2571_v4, %v2457_v44  ;;  %v2467_v43 = vmul.f32 %v5027_v21, %v5468_v18  ;;  %v5481_v36 = vld [vmem:[#allocation44_spill] sm:$0xff]  ;;  %v5483_v53 = vld [vmem:[#allocation45_spill] sm:$0xff] }
 0x4a4   :  { %2779 = vst.msk [vmem:[%s5280_s5 + $0x260] sm:$0xff] %vm479_vm2, %v2674_v46  ;;  %2766 = vst [vmem:[%s5280_s5 + $0x1f8] sm:$0xff] %v2661_v28  ;;  %v2468_v48 = vmul.f32 %v5027_v21, %v5469_v56  ;;  %v2469_v29 = vmul.f32 %v5027_v21, %v5470_v51  ;;  %v2376_v17 = vpop.permute.xlu1 %2375  ;;  %v2470_v38 = vmul.f32 %v5027_v21, %v5475_v6  ;;  %v5484_v46 = vld [vmem:[#allocation67_spill] sm:$0xff]  ;;  %v5485_v28 = vld [vmem:[#allocation46_spill] sm:$0xff] }
 0x4a5   :  { %2767 = vst [vmem:[%s5280_s5 + $0x200] sm:$0xff] %v2662_v59  ;;  %2768 = vst [vmem:[%s5280_s5 + $0x208] sm:$0xff] %v2663_v1  ;;  %v2472_v45 = vmul.f32 %v2376_v17, %v5471_v61  ;;  %v2473_v0 = vmul.f32 %v2376_v17, %v5472_v40  ;;  %v2474_v35 = vmul.f32 %v2376_v17, %v5473_v30  ;;  %v2586_v7 = vpop.permute.xlu0 %2585  ;;  %v5486_v1 = vld [vmem:[#allocation48_spill] sm:$0xff]  ;;  %v5491_v56 = vld [vmem:[#allocation71_spill] sm:$0xff] }
 0x4a6   :  { %2769 = vst [vmem:[%s5280_s5 + $0x210] sm:$0xff] %v2664_v26  ;;  %2770 = vst [vmem:[%s5280_s5 + $0x218] sm:$0xff] %v2665_v11  ;;  %v2475_v58 = vmul.f32 %v2376_v17, %v5474_v27  ;;  %v2476_v55 = vmul.f32 %v2376_v17, %v5476_v10  ;;  %v2477_v2 = vmul.f32 %v2376_v17, %v5477_v9  ;;  %v5487_v11 = vld [vmem:[#allocation47_spill] sm:$0xff]  ;;  %v5490_v18 = vld [vmem:[#allocation72_spill] sm:$0xff] }
 0x4a7   :  { %2771 = vst [vmem:[%s5280_s5 + $0x220] sm:$0xff] %v2666_v15  ;;  %2772 = vst.msk [vmem:[%s5280_s5 + $0x228] sm:$0xff] %vm479_vm2, %v2667_v41  ;;  %v2478_v5 = vmul.f32 %v2376_v17, %v5478_v60  ;;  %v2682_v8 = vadd.f32 %v2586_v7, %v2472_v45  ;;  %v2683_v52 = vadd.f32 %v2586_v7, %v2473_v0  ;;  %v5488_v41 = vld [vmem:[#allocation49_spill] sm:$0xff] }
 0x4a8   :  { %v2684_v49 = vadd.f32 %v2586_v7, %v2474_v35  ;;  %v2685_v42 = vadd.f32 %v2586_v7, %v2475_v58  ;;  %v2471_v13 = vmul.f32 %v5027_v21, %v5479_v25  ;;  %v2686_v57 = vadd.f32 %v2586_v7, %v2476_v55  ;;  %v2581_v37 = vpop.permute.xlu1 %2580  ;;  %v5492_v51 = vld [vmem:[#allocation69_spill] sm:$0xff]  ;;  %v5493_v58 = vld [vmem:[#allocation68_spill] sm:$0xff] }
 0x4a9   :  { %v2687_v62 = vadd.f32 %v2586_v7, %v2477_v2  ;;  %v2688_v63 = vadd.f32 %v2586_v7, %v2478_v5  ;;  %2787 = vst [vmem:[%s5280_s5 + $0x2a0] sm:$0xff] %v2682_v8  ;;  %2788 = vst [vmem:[%s5280_s5 + $0x2a8] sm:$0xff] %v2683_v52  ;;  %v2675_v21 = vadd.f32 %v2581_v37, %v2465_v14  ;;  %v2596_v14 = vpop.permute.xlu0 %2595 }
 0x4aa   :  { %2789 = vst [vmem:[%s5280_s5 + $0x2b0] sm:$0xff] %v2684_v49  ;;  %2790 = vst [vmem:[%s5280_s5 + $0x2b8] sm:$0xff] %v2685_v42  ;;  %v2676_v20 = vadd.f32 %v2581_v37, %v2466_v19  ;;  %v2677_v24 = vadd.f32 %v2581_v37, %v2467_v43  ;;  %v2678_v22 = vadd.f32 %v2581_v37, %v2468_v48 }
 0x4ab   :  { %2791 = vst [vmem:[%s5280_s5 + $0x2c0] sm:$0xff] %v2686_v57  ;;  %2792 = vst [vmem:[%s5280_s5 + $0x2c8] sm:$0xff] %v2687_v62  ;;  %v2679_v16 = vadd.f32 %v2581_v37, %v2469_v29  ;;  %v2680_v23 = vadd.f32 %v2581_v37, %v2470_v38  ;;  %v2681_v47 = vadd.f32 %v2581_v37, %v2471_v13 }
 0x4ac   :  { %2793 = vst.msk [vmem:[%s5280_s5 + $0x2d0] sm:$0xff] %vm479_vm2, %v2688_v63  ;;  %2780 = vst [vmem:[%s5280_s5 + $0x268] sm:$0xff] %v2675_v21  ;;  %v2479_v3 = vmul.f32 %v5111_v12, %v5480_v39  ;;  %v2386_v31 = vpop.permute.xlu1 %2385  ;;  %v2480_v32 = vmul.f32 %v5111_v12, %v5481_v36  ;;  %v2481_v44 = vmul.f32 %v5111_v12, %v5482_v34 }
 0x4ad   :  { %2781 = vst [vmem:[%s5280_s5 + $0x270] sm:$0xff] %v2676_v20  ;;  %2782 = vst [vmem:[%s5280_s5 + $0x278] sm:$0xff] %v2677_v24  ;;  %v2482_v33 = vmul.f32 %v5111_v12, %v5483_v53  ;;  %v2483_v4 = vmul.f32 %v5111_v12, %v5484_v46  ;;  %v2486_v59 = vmul.f32 %v2386_v31, %v5485_v28 }
 0x4ae   :  { %2783 = vst [vmem:[%s5280_s5 + $0x280] sm:$0xff] %v2678_v22  ;;  %2784 = vst [vmem:[%s5280_s5 + $0x288] sm:$0xff] %v2679_v16  ;;  %v2487_v26 = vmul.f32 %v2386_v31, %v5486_v1  ;;  %v2488_v15 = vmul.f32 %v2386_v31, %v5487_v11  ;;  %v2489_v50 = vmul.f32 %v2386_v31, %v5488_v41 }
 0x4af   :  { %2785 = vst [vmem:[%s5280_s5 + $0x290] sm:$0xff] %v2680_v23  ;;  %2786 = vst.msk [vmem:[%s5280_s5 + $0x298] sm:$0xff] %vm479_vm2, %v2681_v47  ;;  %v2490_v19 = vmul.f32 %v2386_v31, %v5489_v54  ;;  %v2491_v43 = vmul.f32 %v2386_v31, %v5490_v18  ;;  %v2492_v48 = vmul.f32 %v2386_v31, %v5491_v56 }
 0x4b0   :  { %v2484_v29 = vmul.f32 %v5111_v12, %v5492_v51  ;;  %v2696_v17 = vadd.f32 %v2596_v14, %v2486_v59  ;;  %v2697_v61 = vadd.f32 %v2596_v14, %v2487_v26  ;;  %v2698_v45 = vadd.f32 %v2596_v14, %v2488_v15  ;;  %v2591_v27 = vpop.permute.xlu1 %2590 }
 0x4b1   :  { %v2699_v40 = vadd.f32 %v2596_v14, %v2489_v50  ;;  %v2700_v0 = vadd.f32 %v2596_v14, %v2490_v19  ;;  %v2701_v30 = vadd.f32 %v2596_v14, %v2491_v43  ;;  %v2702_v35 = vadd.f32 %v2596_v14, %v2492_v48 }
 0x4b2   :  { %v2485_v6 = vmul.f32 %v5111_v12, %v5493_v58  ;;  %2801 = vst [vmem:[%s5280_s5 + $0x310] sm:$0xff] %v2696_v17  ;;  %2802 = vst [vmem:[%s5280_s5 + $0x318] sm:$0xff] %v2697_v61  ;;  %v2689_v38 = vadd.f32 %v2591_v27, %v2479_v3  ;;  %v2690_v10 = vadd.f32 %v2591_v27, %v2480_v32 }
 0x4b3   :  { %2803 = vst [vmem:[%s5280_s5 + $0x320] sm:$0xff] %v2698_v45  ;;  %2804 = vst [vmem:[%s5280_s5 + $0x328] sm:$0xff] %v2699_v40  ;;  %v2691_v55 = vadd.f32 %v2591_v27, %v2481_v44  ;;  %v2692_v12 = vadd.f32 %v2591_v27, %v2482_v33  ;;  %v2693_v9 = vadd.f32 %v2591_v27, %v2483_v4 }
 0x4b4   :  { %2805 = vst [vmem:[%s5280_s5 + $0x330] sm:$0xff] %v2700_v0  ;;  %2806 = vst [vmem:[%s5280_s5 + $0x338] sm:$0xff] %v2701_v30  ;;  %v2694_v2 = vadd.f32 %v2591_v27, %v2484_v29  ;;  %v2695_v60 = vadd.f32 %v2591_v27, %v2485_v6 }
 0x4b5   :  { %2807 = vst.msk [vmem:[%s5280_s5 + $0x340] sm:$0xff] %vm479_vm2, %v2702_v35  ;;  %2794 = vst [vmem:[%s5280_s5 + $0x2d8] sm:$0xff] %v2689_v38 }
 0x4b6   :  { %2795 = vst [vmem:[%s5280_s5 + $0x2e0] sm:$0xff] %v2690_v10  ;;  %2796 = vst [vmem:[%s5280_s5 + $0x2e8] sm:$0xff] %v2691_v55 }
 0x4b7   :  { %2797 = vst [vmem:[%s5280_s5 + $0x2f0] sm:$0xff] %v2692_v12  ;;  %2798 = vst [vmem:[%s5280_s5 + $0x2f8] sm:$0xff] %v2693_v9 }
 0x4b8   :  { %2799 = vst [vmem:[%s5280_s5 + $0x300] sm:$0xff] %v2694_v2  ;;  %2800 = vst.msk [vmem:[%s5280_s5 + $0x308] sm:$0xff] %vm479_vm2, %v2695_v60 }

</bundles_post_ra>
